<compile_context>
chip_gen: v6e
topology: v6e:2x2x1
jax: 0.10.0
libtpu: 0.0.40
codegen_flags: <defaults>
</compile_context>

<pallas_src>
import numpy as np

import jax
import jax.numpy as jnp
from jax.experimental import pallas as pl
from jax.experimental.pallas import tpu as pltpu


# ----------------------------------------------------------------------------
# Fused kernel: conv1 -> ReLU -> pool -> conv2 -> ReLU -> pool -> fc1..fc3
# One grid step = one sample.
# ----------------------------------------------------------------------------
def _lenet5_kernel(x_ref, w1s_ref, b1t_ref, w2s_ref, b2t_ref,
                   a1_ref, p1_ref, a2_ref, p2_ref,
                   wf1_ref, bf1_ref, wf2_ref, bf2_ref, wf3_ref, bf3_ref,
                   logits_ref, feats_ref):
    f32, bf16 = jnp.float32, jnp.bfloat16
    x = x_ref[0]                                                  # (32, 96) f32

    # conv1 (3->6, k5) on pre-padded 32x32 input, + bias + ReLU: (28, 28*6)
    z1 = jnp.dot(x[0:28].astype(bf16), w1s_ref[0], preferred_element_type=f32)
    for kh in range(1, 5):
        z1 = z1 + jnp.dot(x[kh:kh + 28].astype(bf16), w1s_ref[kh],
                          preferred_element_type=f32)
    r1 = jnp.maximum(z1 + b1t_ref[...], 0.0)                      # (28, 168)

    # 2x2 avg pool as two constant matmuls (pool scale folded in): (14, 14*6)
    t1 = jnp.dot(a1_ref[...], r1.astype(bf16), preferred_element_type=f32)
    y1 = jnp.dot(t1.astype(bf16), p1_ref[...], preferred_element_type=f32)

    # conv2 (6->16, k5, valid) + bias + ReLU: (10, 10*16)
    z2 = jnp.dot(y1[0:10].astype(bf16), w2s_ref[0], preferred_element_type=f32)
    for kh in range(1, 5):
        z2 = z2 + jnp.dot(y1[kh:kh + 10].astype(bf16), w2s_ref[kh],
                          preferred_element_type=f32)
    r2 = jnp.maximum(z2 + b2t_ref[...], 0.0)                      # (10, 160)

    # 2x2 avg pool -> pooled features, layout (pi, pj*16 + oc): (5, 80)
    t2 = jnp.dot(a2_ref[...], r2.astype(bf16), preferred_element_type=f32)
    pooled = jnp.dot(t2.astype(bf16), p2_ref[...], preferred_element_type=f32)
    feats_ref[0] = pooled

    # classifier: fc1 weights pre-reordered to consume (pi, pj, oc) rows, so
    # no flatten/transpose is needed on the logits path.
    h = bf1_ref[...]                                              # (1, 120)
    for pi in range(5):
        h = h + jnp.dot(pooled[pi:pi + 1].astype(bf16), wf1_ref[pi],
                        preferred_element_type=f32)
    h = jnp.maximum(h, 0.0)
    h = jnp.maximum(
        jnp.dot(h.astype(bf16), wf2_ref[...], preferred_element_type=f32)
        + bf2_ref[...], 0.0)                                      # (1, 84)
    logits = jnp.dot(h.astype(bf16), wf3_ref[...],
                     preferred_element_type=f32) + bf3_ref[...]   # (1, 2)
    logits_ref[0] = logits


_WEIGHT_KEYS = ("w1s", "b1t", "w2s", "b2t", "a1", "p1", "a2", "p2",
                "wf1", "bf1", "wf2", "bf2", "wf3", "bf3")


def _lenet5_pallas(xp, prep):
    """xp: (B, 32, 96) f32 padded input with lanes = (col, channel)."""
    B = xp.shape[0]
    c2 = lambda b: (0, 0)
    c3 = lambda b: (0, 0, 0)
    const_map = {2: c2, 3: c3}
    weights = [prep[k] for k in _WEIGHT_KEYS]
    in_specs = [pl.BlockSpec((1, 32, 96), lambda b: (b, 0, 0))]
    in_specs += [pl.BlockSpec(w.shape, const_map[w.ndim]) for w in weights]
    return pl.pallas_call(
        _lenet5_kernel,
        out_shape=(jax.ShapeDtypeStruct((B, 1, 2), jnp.float32),
                   jax.ShapeDtypeStruct((B, 5, 80), jnp.float32)),
        grid=(B,),
        in_specs=in_specs,
        out_specs=(pl.BlockSpec((1, 1, 2), lambda b: (b, 0, 0)),
                   pl.BlockSpec((1, 5, 80), lambda b: (b, 0, 0))),
        # Per-sample blocks keep VMEM at ~1.5 MB (weights resident with
        # constant index_maps, double-buffered 12 KB input), so no explicit
        # vmem_limit_bytes is required on v5e (16 MiB scoped) or v7x (64 MiB).
        compiler_params=pltpu.CompilerParams(
            dimension_semantics=("parallel",)),
    )(xp, *weights)


# ----------------------------------------------------------------------------
# Parameter construction & one-time layout prep
# ----------------------------------------------------------------------------
def init_params(key):
    """PyTorch-layout parameters."""
    ks = jax.random.split(key, 10)

    def rnd(k, shape, scale):
        return scale * jax.random.normal(k, shape, dtype=jnp.float32)

    return {
        "w1": rnd(ks[0], (6, 3, 5, 5), 0.1),   "b1": rnd(ks[1], (6,), 0.05),
        "w2": rnd(ks[2], (16, 6, 5, 5), 0.1),  "b2": rnd(ks[3], (16,), 0.05),
        "fc1w": rnd(ks[4], (120, 400), 0.05),  "fc1b": rnd(ks[5], (120,), 0.05),
        "fc2w": rnd(ks[6], (84, 120), 0.05),   "fc2b": rnd(ks[7], (84,), 0.05),
        "fc3w": rnd(ks[8], (2, 84), 0.05),     "fc3b": rnd(ks[9], (2,), 0.05),
    }


def prepare_params(p):
    """One-time, outside-jit layout prep:
       * conv weights -> 5 banded matrices per conv acting on the
         (rows=i, lanes=(j,c)) layout,
       * 2x2 avg pool -> constant 0.5 matmul operands (1/4 scale folded in),
       * fc1 rows reordered to the kernel's (pi, pj, oc) feature layout,
       * matmul operands in bf16, biases (pre-tiled over lane positions) in f32.
    """
    def band(w, in_pos, out_pos):
        w = np.asarray(w, np.float32)              # (OC, IC, KH, KW)
        oc, ic, kh_n, kw_n = w.shape
        m = np.zeros((kh_n, in_pos * ic, out_pos * oc), np.float32)
        for kh in range(kh_n):
            for j in range(out_pos):
                for kw in range(kw_n):
                    jj = j + kw
                    m[kh, jj * ic:(jj + 1) * ic, j * oc:(j + 1) * oc] = \
                        w[:, :, kh, kw].T
        return m

    def pool_rows(n):
        a = np.zeros((n, 2 * n), np.float32)
        for i in range(n):
            a[i, 2 * i] = a[i, 2 * i + 1] = 0.5
        return a

    def pool_lanes(n, c):
        m = np.zeros((2 * n * c, n * c), np.float32)
        eye = 0.5 * np.eye(c, dtype=np.float32)
        for j in range(n):
            for d in range(2):
                m[(2 * j + d) * c:(2 * j + d) * c + c, j * c:j * c + c] = eye
        return m

    bf16, f32 = jnp.bfloat16, jnp.float32
    fc1 = np.asarray(p["fc1w"], np.float32).reshape(120, 16, 5, 5)
    wf1 = fc1.transpose(2, 3, 1, 0).reshape(5, 80, 120)   # (pi, pj*16+oc, n)

    return {
        "w1s": jnp.asarray(band(p["w1"], 32, 28), bf16),            # (5, 96, 168)
        "b1t": jnp.asarray(np.tile(np.asarray(p["b1"], np.float32), 28)[None, :], f32),
        "w2s": jnp.asarray(band(p["w2"], 14, 10), bf16),            # (5, 84, 160)
        "b2t": jnp.asarray(np.tile(np.asarray(p["b2"], np.float32), 10)[None, :], f32),
        "a1":  jnp.asarray(pool_rows(14), bf16),                    # (14, 28)
        "p1":  jnp.asarray(pool_lanes(14, 6), bf16),                # (168, 84)
        "a2":  jnp.asarray(pool_rows(5), bf16),                     # (5, 10)
        "p2":  jnp.asarray(pool_lanes(5, 16), bf16),                # (160, 80)
        "wf1": jnp.asarray(wf1, bf16),                              # (5, 80, 120)
        "bf1": jnp.asarray(np.asarray(p["fc1b"], np.float32)[None, :], f32),
        "wf2": jnp.asarray(np.asarray(p["fc2w"], np.float32).T, bf16),   # (120, 84)
        "bf2": jnp.asarray(np.asarray(p["fc2b"], np.float32)[None, :], f32),
        "wf3": jnp.asarray(np.asarray(p["fc3w"], np.float32).T, bf16),   # (84, 2)
        "bf3": jnp.asarray(np.asarray(p["fc3b"], np.float32)[None, :], f32),
    }


# ----------------------------------------------------------------------------
# Full forward (1 pallas_call + tiny XLA glue)
# ----------------------------------------------------------------------------
def lenet5_forward(x, prep):
    """x: (B, 3, 28, 28) NCHW -> (logits (B, 2), features (B, 16, 5, 5))."""
    B = x.shape[0]
    x_nhwc = jnp.transpose(x, (0, 2, 3, 1)).astype(jnp.float32)
    xp = jnp.pad(x_nhwc, ((0, 0), (2, 2), (2, 2), (0, 0)))        # (B, 32, 32, 3)
    xp = xp.reshape(B, 32, 32 * 3)                                # lanes = (j, c)

    logits3, feats3 = _lenet5_pallas(xp, prep)
    logits = logits3.reshape(B, 2)
    features = feats3.reshape(B, 5, 5, 16).transpose(0, 3, 1, 2)  # NCHW
    return logits, features


# ----------------------------------------------------------------------------
# Pure-JAX reference (for correctness checking only)
# ----------------------------------------------------------------------------
def _avg_pool_ref(y):
    B, C, H, W = y.shape
    return y.reshape(B, C, H // 2, 2, W // 2, 2).mean(axis=(3, 5))


def _reference_forward(x, params):
    hi = jax.lax.Precision.HIGHEST
    dn = ("NCHW", "OIHW", "NCHW")
    y = jax.lax.conv_general_dilated(x, params["w1"], (1, 1), ((2, 2), (2, 2)),
                                     dimension_numbers=dn, precision=hi)
    y = jnp.maximum(y + params["b1"].reshape(1, -1, 1, 1), 0.0)
    y = _avg_pool_ref(y)
    y = jax.lax.conv_general_dilated(y, params["w2"], (1, 1), ((0, 0), (0, 0)),
                                     dimension_numbers=dn, precision=hi)
    y = jnp.maximum(y + params["b2"].reshape(1, -1, 1, 1), 0.0)
    feats = _avg_pool_ref(y)
    h = feats.reshape(x.shape[0], -1)
    h = jnp.maximum(jnp.dot(h, params["fc1w"].T, precision=hi) + params["fc1b"], 0.0)
    h = jnp.maximum(jnp.dot(h, params["fc2w"].T, precision=hi) + params["fc2b"], 0.0)
    logits = jnp.dot(h, params["fc3w"].T, precision=hi) + params["fc3b"]
    return logits, feats


if __name__ == "__main__":
    key = jax.random.PRNGKey(0)
    k_x, k_p = jax.random.split(key)
    x = jax.random.normal(k_x, (2, 3, 28, 28), dtype=jnp.float32)
    params = init_params(k_p)
    prep = prepare_params(params)          # one-time layout prep (outside jit)

    fwd = jax.jit(lenet5_forward)
    logits, features = fwd(x, prep)
    jax.block_until_ready(logits)
    jax.block_until_ready(features)

    assert logits.shape == (2, 2)
    assert features.shape == (2, 16, 5, 5)

    ref_logits, ref_features = jax.jit(_reference_forward)(x, params)
    assert jnp.allclose(logits, ref_logits, rtol=2e-2, atol=2e-2)
    assert jnp.allclose(features, ref_features, rtol=2e-2, atol=2e-2)

    print("KERNEL_OK")
</pallas_src>

<mosaic_0001>
module attributes {stable_mosaic.version = 11 : i64} {
  func.func @_lenet5_kernel(%arg0: i32, %arg1: memref<1x32x96xf32, #tpu.memory_space<vmem>>, %arg2: memref<5x96x168xbf16, #tpu.memory_space<vmem>>, %arg3: memref<1x168xf32, #tpu.memory_space<vmem>>, %arg4: memref<5x84x160xbf16, #tpu.memory_space<vmem>>, %arg5: memref<1x160xf32, #tpu.memory_space<vmem>>, %arg6: memref<14x28xbf16, #tpu.memory_space<vmem>>, %arg7: memref<168x84xbf16, #tpu.memory_space<vmem>>, %arg8: memref<5x10xbf16, #tpu.memory_space<vmem>>, %arg9: memref<160x80xbf16, #tpu.memory_space<vmem>>, %arg10: memref<5x80x120xbf16, #tpu.memory_space<vmem>>, %arg11: memref<1x120xf32, #tpu.memory_space<vmem>>, %arg12: memref<120x84xbf16, #tpu.memory_space<vmem>>, %arg13: memref<1x84xf32, #tpu.memory_space<vmem>>, %arg14: memref<84x2xbf16, #tpu.memory_space<vmem>>, %arg15: memref<1x2xf32, #tpu.memory_space<vmem>>, %arg16: memref<1x1x2xf32, #tpu.memory_space<vmem>>, %arg17: memref<1x5x80xf32, #tpu.memory_space<vmem>>) attributes {dimension_semantics = [#tpu.dimension_semantics<parallel>], iteration_bounds = array<i64: 2>, scalar_prefetch = 0 : i64, scratch_operands = 0 : i64, tpu.core_type = #tpu.core_type<tc>, window_params = [{transform_indices = @transform_0, window_bounds = array<i64: 1, 32, 96>}, {pipeline_mode = #tpu.pipeline_mode<synchronous>, transform_indices = @transform_1, window_bounds = array<i64: 5, 96, 168>}, {pipeline_mode = #tpu.pipeline_mode<synchronous>, transform_indices = @transform_2, window_bounds = array<i64: 1, 168>}, {pipeline_mode = #tpu.pipeline_mode<synchronous>, transform_indices = @transform_3, window_bounds = array<i64: 5, 84, 160>}, {pipeline_mode = #tpu.pipeline_mode<synchronous>, transform_indices = @transform_4, window_bounds = array<i64: 1, 160>}, {pipeline_mode = #tpu.pipeline_mode<synchronous>, transform_indices = @transform_5, window_bounds = array<i64: 14, 28>}, {pipeline_mode = #tpu.pipeline_mode<synchronous>, transform_indices = @transform_6, window_bounds = array<i64: 168, 84>}, {pipeline_mode = #tpu.pipeline_mode<synchronous>, transform_indices = @transform_7, window_bounds = array<i64: 5, 10>}, {pipeline_mode = #tpu.pipeline_mode<synchronous>, transform_indices = @transform_8, window_bounds = array<i64: 160, 80>}, {pipeline_mode = #tpu.pipeline_mode<synchronous>, transform_indices = @transform_9, window_bounds = array<i64: 5, 80, 120>}, {pipeline_mode = #tpu.pipeline_mode<synchronous>, transform_indices = @transform_10, window_bounds = array<i64: 1, 120>}, {pipeline_mode = #tpu.pipeline_mode<synchronous>, transform_indices = @transform_11, window_bounds = array<i64: 120, 84>}, {pipeline_mode = #tpu.pipeline_mode<synchronous>, transform_indices = @transform_12, window_bounds = array<i64: 1, 84>}, {pipeline_mode = #tpu.pipeline_mode<synchronous>, transform_indices = @transform_13, window_bounds = array<i64: 84, 2>}, {pipeline_mode = #tpu.pipeline_mode<synchronous>, transform_indices = @transform_14, window_bounds = array<i64: 1, 2>}, {transform_indices = @transform_15, window_bounds = array<i64: 1, 1, 2>}, {transform_indices = @transform_16, window_bounds = array<i64: 1, 5, 80>}]} {
    %c0 = arith.constant 0 : index
    %c0_0 = arith.constant 0 : index
    %c0_1 = arith.constant 0 : index
    %0 = vector.load %arg1[%c0, %c0_0, %c0_1] : memref<1x32x96xf32, #tpu.memory_space<vmem>>, vector<1x32x96xf32>
    %1 = vector.shape_cast %0 : vector<1x32x96xf32> to vector<32x96xf32>
    %2 = vector.extract_strided_slice %1 {offsets = [0, 0], sizes = [28, 96], strides = [1, 1]} : vector<32x96xf32> to vector<28x96xf32>
    %3 = arith.truncf %2 : vector<28x96xf32> to vector<28x96xbf16>
    %c0_2 = arith.constant 0 : index
    %c0_3 = arith.constant 0 : index
    %c0_4 = arith.constant 0 : index
    %4 = vector.load %arg2[%c0_2, %c0_3, %c0_4] : memref<5x96x168xbf16, #tpu.memory_space<vmem>>, vector<1x96x168xbf16>
    %5 = vector.shape_cast %4 : vector<1x96x168xbf16> to vector<96x168xbf16>
    %cst = arith.constant dense<0.000000e+00> : vector<28x168xf32>
    %6 = tpu.matmul %3, %5, %cst {dimension_numbers = #tpu.dot_dimension_numbers<[1], [0], [0], [1], [0, 0, 1, 1], [], []>} : vector<28x96xbf16>, vector<96x168xbf16>, vector<28x168xf32> -> vector<28x168xf32>
    %7 = vector.extract_strided_slice %1 {offsets = [1, 0], sizes = [28, 96], strides = [1, 1]} : vector<32x96xf32> to vector<28x96xf32>
    %8 = arith.truncf %7 : vector<28x96xf32> to vector<28x96xbf16>
    %c1 = arith.constant 1 : index
    %c0_5 = arith.constant 0 : index
    %c0_6 = arith.constant 0 : index
    %9 = vector.load %arg2[%c1, %c0_5, %c0_6] : memref<5x96x168xbf16, #tpu.memory_space<vmem>>, vector<1x96x168xbf16>
    %10 = vector.shape_cast %9 : vector<1x96x168xbf16> to vector<96x168xbf16>
    %cst_7 = arith.constant dense<0.000000e+00> : vector<28x168xf32>
    %11 = tpu.matmul %8, %10, %cst_7 {dimension_numbers = #tpu.dot_dimension_numbers<[1], [0], [0], [1], [0, 0, 1, 1], [], []>} : vector<28x96xbf16>, vector<96x168xbf16>, vector<28x168xf32> -> vector<28x168xf32>
    %12 = arith.addf %6, %11 : vector<28x168xf32>
    %13 = vector.extract_strided_slice %1 {offsets = [2, 0], sizes = [28, 96], strides = [1, 1]} : vector<32x96xf32> to vector<28x96xf32>
    %14 = arith.truncf %13 : vector<28x96xf32> to vector<28x96xbf16>
    %c2 = arith.constant 2 : index
    %c0_8 = arith.constant 0 : index
    %c0_9 = arith.constant 0 : index
    %15 = vector.load %arg2[%c2, %c0_8, %c0_9] : memref<5x96x168xbf16, #tpu.memory_space<vmem>>, vector<1x96x168xbf16>
    %16 = vector.shape_cast %15 : vector<1x96x168xbf16> to vector<96x168xbf16>
    %cst_10 = arith.constant dense<0.000000e+00> : vector<28x168xf32>
    %17 = tpu.matmul %14, %16, %cst_10 {dimension_numbers = #tpu.dot_dimension_numbers<[1], [0], [0], [1], [0, 0, 1, 1], [], []>} : vector<28x96xbf16>, vector<96x168xbf16>, vector<28x168xf32> -> vector<28x168xf32>
    %18 = arith.addf %12, %17 : vector<28x168xf32>
    %19 = vector.extract_strided_slice %1 {offsets = [3, 0], sizes = [28, 96], strides = [1, 1]} : vector<32x96xf32> to vector<28x96xf32>
    %20 = arith.truncf %19 : vector<28x96xf32> to vector<28x96xbf16>
    %c3 = arith.constant 3 : index
    %c0_11 = arith.constant 0 : index
    %c0_12 = arith.constant 0 : index
    %21 = vector.load %arg2[%c3, %c0_11, %c0_12] : memref<5x96x168xbf16, #tpu.memory_space<vmem>>, vector<1x96x168xbf16>
    %22 = vector.shape_cast %21 : vector<1x96x168xbf16> to vector<96x168xbf16>
    %cst_13 = arith.constant dense<0.000000e+00> : vector<28x168xf32>
    %23 = tpu.matmul %20, %22, %cst_13 {dimension_numbers = #tpu.dot_dimension_numbers<[1], [0], [0], [1], [0, 0, 1, 1], [], []>} : vector<28x96xbf16>, vector<96x168xbf16>, vector<28x168xf32> -> vector<28x168xf32>
    %24 = arith.addf %18, %23 : vector<28x168xf32>
    %25 = vector.extract_strided_slice %1 {offsets = [4, 0], sizes = [28, 96], strides = [1, 1]} : vector<32x96xf32> to vector<28x96xf32>
    %26 = arith.truncf %25 : vector<28x96xf32> to vector<28x96xbf16>
    %c4 = arith.constant 4 : index
    %c0_14 = arith.constant 0 : index
    %c0_15 = arith.constant 0 : index
    %27 = vector.load %arg2[%c4, %c0_14, %c0_15] : memref<5x96x168xbf16, #tpu.memory_space<vmem>>, vector<1x96x168xbf16>
    %28 = vector.shape_cast %27 : vector<1x96x168xbf16> to vector<96x168xbf16>
    %cst_16 = arith.constant dense<0.000000e+00> : vector<28x168xf32>
    %29 = tpu.matmul %26, %28, %cst_16 {dimension_numbers = #tpu.dot_dimension_numbers<[1], [0], [0], [1], [0, 0, 1, 1], [], []>} : vector<28x96xbf16>, vector<96x168xbf16>, vector<28x168xf32> -> vector<28x168xf32>
    %30 = arith.addf %24, %29 : vector<28x168xf32>
    %c0_17 = arith.constant 0 : index
    %c0_18 = arith.constant 0 : index
    %31 = vector.load %arg3[%c0_17, %c0_18] : memref<1x168xf32, #tpu.memory_space<vmem>>, vector<1x168xf32>
    %32 = vector.broadcast %31 : vector<1x168xf32> to vector<28x168xf32>
    %33 = arith.addf %30, %32 : vector<28x168xf32>
    %cst_19 = arith.constant 0.000000e+00 : f32
    %34 = vector.broadcast %cst_19 : f32 to vector<28x168xf32>
    %35 = arith.maximumf %33, %34 : vector<28x168xf32>
    %c0_20 = arith.constant 0 : index
    %c0_21 = arith.constant 0 : index
    %36 = vector.load %arg6[%c0_20, %c0_21] : memref<14x28xbf16, #tpu.memory_space<vmem>>, vector<14x28xbf16>
    %37 = arith.truncf %35 : vector<28x168xf32> to vector<28x168xbf16>
    %cst_22 = arith.constant dense<0.000000e+00> : vector<14x168xf32>
    %38 = tpu.matmul %36, %37, %cst_22 {dimension_numbers = #tpu.dot_dimension_numbers<[1], [0], [0], [1], [0, 0, 1, 1], [], []>} : vector<14x28xbf16>, vector<28x168xbf16>, vector<14x168xf32> -> vector<14x168xf32>
    %39 = arith.truncf %38 : vector<14x168xf32> to vector<14x168xbf16>
    %c0_23 = arith.constant 0 : index
    %c0_24 = arith.constant 0 : index
    %40 = vector.load %arg7[%c0_23, %c0_24] : memref<168x84xbf16, #tpu.memory_space<vmem>>, vector<168x84xbf16>
    %cst_25 = arith.constant dense<0.000000e+00> : vector<14x84xf32>
    %41 = tpu.matmul %39, %40, %cst_25 {dimension_numbers = #tpu.dot_dimension_numbers<[1], [0], [0], [1], [0, 0, 1, 1], [], []>} : vector<14x168xbf16>, vector<168x84xbf16>, vector<14x84xf32> -> vector<14x84xf32>
    %42 = vector.extract_strided_slice %41 {offsets = [0, 0], sizes = [10, 84], strides = [1, 1]} : vector<14x84xf32> to vector<10x84xf32>
    %43 = arith.truncf %42 : vector<10x84xf32> to vector<10x84xbf16>
    %c0_26 = arith.constant 0 : index
    %c0_27 = arith.constant 0 : index
    %c0_28 = arith.constant 0 : index
    %44 = vector.load %arg4[%c0_26, %c0_27, %c0_28] : memref<5x84x160xbf16, #tpu.memory_space<vmem>>, vector<1x84x160xbf16>
    %45 = vector.shape_cast %44 : vector<1x84x160xbf16> to vector<84x160xbf16>
    %cst_29 = arith.constant dense<0.000000e+00> : vector<10x160xf32>
    %46 = tpu.matmul %43, %45, %cst_29 {dimension_numbers = #tpu.dot_dimension_numbers<[1], [0], [0], [1], [0, 0, 1, 1], [], []>} : vector<10x84xbf16>, vector<84x160xbf16>, vector<10x160xf32> -> vector<10x160xf32>
    %47 = vector.extract_strided_slice %41 {offsets = [1, 0], sizes = [10, 84], strides = [1, 1]} : vector<14x84xf32> to vector<10x84xf32>
    %48 = arith.truncf %47 : vector<10x84xf32> to vector<10x84xbf16>
    %c1_30 = arith.constant 1 : index
    %c0_31 = arith.constant 0 : index
    %c0_32 = arith.constant 0 : index
    %49 = vector.load %arg4[%c1_30, %c0_31, %c0_32] : memref<5x84x160xbf16, #tpu.memory_space<vmem>>, vector<1x84x160xbf16>
    %50 = vector.shape_cast %49 : vector<1x84x160xbf16> to vector<84x160xbf16>
    %cst_33 = arith.constant dense<0.000000e+00> : vector<10x160xf32>
    %51 = tpu.matmul %48, %50, %cst_33 {dimension_numbers = #tpu.dot_dimension_numbers<[1], [0], [0], [1], [0, 0, 1, 1], [], []>} : vector<10x84xbf16>, vector<84x160xbf16>, vector<10x160xf32> -> vector<10x160xf32>
    %52 = arith.addf %46, %51 : vector<10x160xf32>
    %53 = vector.extract_strided_slice %41 {offsets = [2, 0], sizes = [10, 84], strides = [1, 1]} : vector<14x84xf32> to vector<10x84xf32>
    %54 = arith.truncf %53 : vector<10x84xf32> to vector<10x84xbf16>
    %c2_34 = arith.constant 2 : index
    %c0_35 = arith.constant 0 : index
    %c0_36 = arith.constant 0 : index
    %55 = vector.load %arg4[%c2_34, %c0_35, %c0_36] : memref<5x84x160xbf16, #tpu.memory_space<vmem>>, vector<1x84x160xbf16>
    %56 = vector.shape_cast %55 : vector<1x84x160xbf16> to vector<84x160xbf16>
    %cst_37 = arith.constant dense<0.000000e+00> : vector<10x160xf32>
    %57 = tpu.matmul %54, %56, %cst_37 {dimension_numbers = #tpu.dot_dimension_numbers<[1], [0], [0], [1], [0, 0, 1, 1], [], []>} : vector<10x84xbf16>, vector<84x160xbf16>, vector<10x160xf32> -> vector<10x160xf32>
    %58 = arith.addf %52, %57 : vector<10x160xf32>
    %59 = vector.extract_strided_slice %41 {offsets = [3, 0], sizes = [10, 84], strides = [1, 1]} : vector<14x84xf32> to vector<10x84xf32>
    %60 = arith.truncf %59 : vector<10x84xf32> to vector<10x84xbf16>
    %c3_38 = arith.constant 3 : index
    %c0_39 = arith.constant 0 : index
    %c0_40 = arith.constant 0 : index
    %61 = vector.load %arg4[%c3_38, %c0_39, %c0_40] : memref<5x84x160xbf16, #tpu.memory_space<vmem>>, vector<1x84x160xbf16>
    %62 = vector.shape_cast %61 : vector<1x84x160xbf16> to vector<84x160xbf16>
    %cst_41 = arith.constant dense<0.000000e+00> : vector<10x160xf32>
    %63 = tpu.matmul %60, %62, %cst_41 {dimension_numbers = #tpu.dot_dimension_numbers<[1], [0], [0], [1], [0, 0, 1, 1], [], []>} : vector<10x84xbf16>, vector<84x160xbf16>, vector<10x160xf32> -> vector<10x160xf32>
    %64 = arith.addf %58, %63 : vector<10x160xf32>
    %65 = vector.extract_strided_slice %41 {offsets = [4, 0], sizes = [10, 84], strides = [1, 1]} : vector<14x84xf32> to vector<10x84xf32>
    %66 = arith.truncf %65 : vector<10x84xf32> to vector<10x84xbf16>
    %c4_42 = arith.constant 4 : index
    %c0_43 = arith.constant 0 : index
    %c0_44 = arith.constant 0 : index
    %67 = vector.load %arg4[%c4_42, %c0_43, %c0_44] : memref<5x84x160xbf16, #tpu.memory_space<vmem>>, vector<1x84x160xbf16>
    %68 = vector.shape_cast %67 : vector<1x84x160xbf16> to vector<84x160xbf16>
    %cst_45 = arith.constant dense<0.000000e+00> : vector<10x160xf32>
    %69 = tpu.matmul %66, %68, %cst_45 {dimension_numbers = #tpu.dot_dimension_numbers<[1], [0], [0], [1], [0, 0, 1, 1], [], []>} : vector<10x84xbf16>, vector<84x160xbf16>, vector<10x160xf32> -> vector<10x160xf32>
    %70 = arith.addf %64, %69 : vector<10x160xf32>
    %c0_46 = arith.constant 0 : index
    %c0_47 = arith.constant 0 : index
    %71 = vector.load %arg5[%c0_46, %c0_47] : memref<1x160xf32, #tpu.memory_space<vmem>>, vector<1x160xf32>
    %72 = vector.broadcast %71 : vector<1x160xf32> to vector<10x160xf32>
    %73 = arith.addf %70, %72 : vector<10x160xf32>
    %cst_48 = arith.constant 0.000000e+00 : f32
    %74 = vector.broadcast %cst_48 : f32 to vector<10x160xf32>
    %75 = arith.maximumf %73, %74 : vector<10x160xf32>
    %c0_49 = arith.constant 0 : index
    %c0_50 = arith.constant 0 : index
    %76 = vector.load %arg8[%c0_49, %c0_50] : memref<5x10xbf16, #tpu.memory_space<vmem>>, vector<5x10xbf16>
    %77 = arith.truncf %75 : vector<10x160xf32> to vector<10x160xbf16>
    %cst_51 = arith.constant dense<0.000000e+00> : vector<5x160xf32>
    %78 = tpu.matmul %76, %77, %cst_51 {dimension_numbers = #tpu.dot_dimension_numbers<[1], [0], [0], [1], [0, 0, 1, 1], [], []>} : vector<5x10xbf16>, vector<10x160xbf16>, vector<5x160xf32> -> vector<5x160xf32>
    %79 = arith.truncf %78 : vector<5x160xf32> to vector<5x160xbf16>
    %c0_52 = arith.constant 0 : index
    %c0_53 = arith.constant 0 : index
    %80 = vector.load %arg9[%c0_52, %c0_53] : memref<160x80xbf16, #tpu.memory_space<vmem>>, vector<160x80xbf16>
    %cst_54 = arith.constant dense<0.000000e+00> : vector<5x80xf32>
    %81 = tpu.matmul %79, %80, %cst_54 {dimension_numbers = #tpu.dot_dimension_numbers<[1], [0], [0], [1], [0, 0, 1, 1], [], []>} : vector<5x160xbf16>, vector<160x80xbf16>, vector<5x80xf32> -> vector<5x80xf32>
    %c0_55 = arith.constant 0 : index
    %c0_56 = arith.constant 0 : index
    %c0_57 = arith.constant 0 : index
    %82 = vector.load %arg17[%c0_55, %c0_56, %c0_57] : memref<1x5x80xf32, #tpu.memory_space<vmem>>, vector<1x5x80xf32>
    %83 = vector.shape_cast %82 : vector<1x5x80xf32> to vector<5x80xf32>
    %84 = vector.shape_cast %81 : vector<5x80xf32> to vector<1x5x80xf32>
    tpu.vector_store %arg17[%c0_55, %c0_56, %c0_57], %84 {strides = array<i32>} : memref<1x5x80xf32, #tpu.memory_space<vmem>>, vector<1x5x80xf32>,
    %c0_58 = arith.constant 0 : index
    %c0_59 = arith.constant 0 : index
    %85 = vector.load %arg11[%c0_58, %c0_59] : memref<1x120xf32, #tpu.memory_space<vmem>>, vector<1x120xf32>
    %86 = vector.extract_strided_slice %81 {offsets = [0, 0], sizes = [1, 80], strides = [1, 1]} : vector<5x80xf32> to vector<1x80xf32>
    %87 = arith.truncf %86 : vector<1x80xf32> to vector<1x80xbf16>
    %c0_60 = arith.constant 0 : index
    %c0_61 = arith.constant 0 : index
    %c0_62 = arith.constant 0 : index
    %88 = vector.load %arg10[%c0_60, %c0_61, %c0_62] : memref<5x80x120xbf16, #tpu.memory_space<vmem>>, vector<1x80x120xbf16>
    %89 = vector.shape_cast %88 : vector<1x80x120xbf16> to vector<80x120xbf16>
    %cst_63 = arith.constant dense<0.000000e+00> : vector<1x120xf32>
    %90 = tpu.matmul %87, %89, %cst_63 {dimension_numbers = #tpu.dot_dimension_numbers<[1], [0], [0], [1], [0, 0, 1, 1], [], []>} : vector<1x80xbf16>, vector<80x120xbf16>, vector<1x120xf32> -> vector<1x120xf32>
    %91 = arith.addf %85, %90 : vector<1x120xf32>
    %92 = vector.extract_strided_slice %81 {offsets = [1, 0], sizes = [1, 80], strides = [1, 1]} : vector<5x80xf32> to vector<1x80xf32>
    %93 = arith.truncf %92 : vector<1x80xf32> to vector<1x80xbf16>
    %c1_64 = arith.constant 1 : index
    %c0_65 = arith.constant 0 : index
    %c0_66 = arith.constant 0 : index
    %94 = vector.load %arg10[%c1_64, %c0_65, %c0_66] : memref<5x80x120xbf16, #tpu.memory_space<vmem>>, vector<1x80x120xbf16>
    %95 = vector.shape_cast %94 : vector<1x80x120xbf16> to vector<80x120xbf16>
    %cst_67 = arith.constant dense<0.000000e+00> : vector<1x120xf32>
    %96 = tpu.matmul %93, %95, %cst_67 {dimension_numbers = #tpu.dot_dimension_numbers<[1], [0], [0], [1], [0, 0, 1, 1], [], []>} : vector<1x80xbf16>, vector<80x120xbf16>, vector<1x120xf32> -> vector<1x120xf32>
    %97 = arith.addf %91, %96 : vector<1x120xf32>
    %98 = vector.extract_strided_slice %81 {offsets = [2, 0], sizes = [1, 80], strides = [1, 1]} : vector<5x80xf32> to vector<1x80xf32>
    %99 = arith.truncf %98 : vector<1x80xf32> to vector<1x80xbf16>
    %c2_68 = arith.constant 2 : index
    %c0_69 = arith.constant 0 : index
    %c0_70 = arith.constant 0 : index
    %100 = vector.load %arg10[%c2_68, %c0_69, %c0_70] : memref<5x80x120xbf16, #tpu.memory_space<vmem>>, vector<1x80x120xbf16>
    %101 = vector.shape_cast %100 : vector<1x80x120xbf16> to vector<80x120xbf16>
    %cst_71 = arith.constant dense<0.000000e+00> : vector<1x120xf32>
    %102 = tpu.matmul %99, %101, %cst_71 {dimension_numbers = #tpu.dot_dimension_numbers<[1], [0], [0], [1], [0, 0, 1, 1], [], []>} : vector<1x80xbf16>, vector<80x120xbf16>, vector<1x120xf32> -> vector<1x120xf32>
    %103 = arith.addf %97, %102 : vector<1x120xf32>
    %104 = vector.extract_strided_slice %81 {offsets = [3, 0], sizes = [1, 80], strides = [1, 1]} : vector<5x80xf32> to vector<1x80xf32>
    %105 = arith.truncf %104 : vector<1x80xf32> to vector<1x80xbf16>
    %c3_72 = arith.constant 3 : index
    %c0_73 = arith.constant 0 : index
    %c0_74 = arith.constant 0 : index
    %106 = vector.load %arg10[%c3_72, %c0_73, %c0_74] : memref<5x80x120xbf16, #tpu.memory_space<vmem>>, vector<1x80x120xbf16>
    %107 = vector.shape_cast %106 : vector<1x80x120xbf16> to vector<80x120xbf16>
    %cst_75 = arith.constant dense<0.000000e+00> : vector<1x120xf32>
    %108 = tpu.matmul %105, %107, %cst_75 {dimension_numbers = #tpu.dot_dimension_numbers<[1], [0], [0], [1], [0, 0, 1, 1], [], []>} : vector<1x80xbf16>, vector<80x120xbf16>, vector<1x120xf32> -> vector<1x120xf32>
    %109 = arith.addf %103, %108 : vector<1x120xf32>
    %110 = vector.extract_strided_slice %81 {offsets = [4, 0], sizes = [1, 80], strides = [1, 1]} : vector<5x80xf32> to vector<1x80xf32>
    %111 = arith.truncf %110 : vector<1x80xf32> to vector<1x80xbf16>
    %c4_76 = arith.constant 4 : index
    %c0_77 = arith.constant 0 : index
    %c0_78 = arith.constant 0 : index
    %112 = vector.load %arg10[%c4_76, %c0_77, %c0_78] : memref<5x80x120xbf16, #tpu.memory_space<vmem>>, vector<1x80x120xbf16>
    %113 = vector.shape_cast %112 : vector<1x80x120xbf16> to vector<80x120xbf16>
    %cst_79 = arith.constant dense<0.000000e+00> : vector<1x120xf32>
    %114 = tpu.matmul %111, %113, %cst_79 {dimension_numbers = #tpu.dot_dimension_numbers<[1], [0], [0], [1], [0, 0, 1, 1], [], []>} : vector<1x80xbf16>, vector<80x120xbf16>, vector<1x120xf32> -> vector<1x120xf32>
    %115 = arith.addf %109, %114 : vector<1x120xf32>
    %cst_80 = arith.constant 0.000000e+00 : f32
    %116 = vector.broadcast %cst_80 : f32 to vector<1x120xf32>
    %117 = arith.maximumf %115, %116 : vector<1x120xf32>
    %118 = arith.truncf %117 : vector<1x120xf32> to vector<1x120xbf16>
    %c0_81 = arith.constant 0 : index
    %c0_82 = arith.constant 0 : index
    %119 = vector.load %arg12[%c0_81, %c0_82] : memref<120x84xbf16, #tpu.memory_space<vmem>>, vector<120x84xbf16>
    %cst_83 = arith.constant dense<0.000000e+00> : vector<1x84xf32>
    %120 = tpu.matmul %118, %119, %cst_83 {dimension_numbers = #tpu.dot_dimension_numbers<[1], [0], [0], [1], [0, 0, 1, 1], [], []>} : vector<1x120xbf16>, vector<120x84xbf16>, vector<1x84xf32> -> vector<1x84xf32>
    %c0_84 = arith.constant 0 : index
    %c0_85 = arith.constant 0 : index
    %121 = vector.load %arg13[%c0_84, %c0_85] : memref<1x84xf32, #tpu.memory_space<vmem>>, vector<1x84xf32>
    %122 = arith.addf %120, %121 : vector<1x84xf32>
    %cst_86 = arith.constant 0.000000e+00 : f32
    %123 = vector.broadcast %cst_86 : f32 to vector<1x84xf32>
    %124 = arith.maximumf %122, %123 : vector<1x84xf32>
    %125 = arith.truncf %124 : vector<1x84xf32> to vector<1x84xbf16>
    %c0_87 = arith.constant 0 : index
    %c0_88 = arith.constant 0 : index
    %126 = vector.load %arg14[%c0_87, %c0_88] : memref<84x2xbf16, #tpu.memory_space<vmem>>, vector<84x2xbf16>
    %cst_89 = arith.constant dense<0.000000e+00> : vector<1x2xf32>
    %127 = tpu.matmul %125, %126, %cst_89 {dimension_numbers = #tpu.dot_dimension_numbers<[1], [0], [0], [1], [0, 0, 1, 1], [], []>} : vector<1x84xbf16>, vector<84x2xbf16>, vector<1x2xf32> -> vector<1x2xf32>
    %c0_90 = arith.constant 0 : index
    %c0_91 = arith.constant 0 : index
    %128 = vector.load %arg15[%c0_90, %c0_91] : memref<1x2xf32, #tpu.memory_space<vmem>>, vector<1x2xf32>
    %129 = arith.addf %127, %128 : vector<1x2xf32>
    %c0_92 = arith.constant 0 : index
    %c0_93 = arith.constant 0 : index
    %c0_94 = arith.constant 0 : index
    %130 = vector.load %arg16[%c0_92, %c0_93, %c0_94] : memref<1x1x2xf32, #tpu.memory_space<vmem>>, vector<1x1x2xf32>
    %131 = vector.shape_cast %130 : vector<1x1x2xf32> to vector<1x2xf32>
    %132 = vector.shape_cast %129 : vector<1x2xf32> to vector<1x1x2xf32>
    tpu.vector_store %arg16[%c0_92, %c0_93, %c0_94], %132 {strides = array<i32>} : memref<1x1x2xf32, #tpu.memory_space<vmem>>, vector<1x1x2xf32>,
    return
  }
  func.func @transform_0(%arg0: i32) -> (i32, i32, i32) {
    %c0_i32 = arith.constant 0 : i32
    %c0_i32_0 = arith.constant 0 : i32
    %c0_i32_1 = arith.constant 0 : i32
    return %arg0, %c0_i32, %c0_i32_0 : i32, i32, i32
  }
  func.func @transform_1(%arg0: i32) -> (i32, i32, i32) {
    %c0_i32 = arith.constant 0 : i32
    %c0_i32_0 = arith.constant 0 : i32
    %c0_i32_1 = arith.constant 0 : i32
    %c0_i32_2 = arith.constant 0 : i32
    return %c0_i32, %c0_i32_0, %c0_i32_1 : i32, i32, i32
  }
  func.func @transform_2(%arg0: i32) -> (i32, i32) {
    %c0_i32 = arith.constant 0 : i32
    %c0_i32_0 = arith.constant 0 : i32
    %c0_i32_1 = arith.constant 0 : i32
    return %c0_i32, %c0_i32_0 : i32, i32
  }
  func.func @transform_3(%arg0: i32) -> (i32, i32, i32) {
    %c0_i32 = arith.constant 0 : i32
    %c0_i32_0 = arith.constant 0 : i32
    %c0_i32_1 = arith.constant 0 : i32
    %c0_i32_2 = arith.constant 0 : i32
    return %c0_i32, %c0_i32_0, %c0_i32_1 : i32, i32, i32
  }
  func.func @transform_4(%arg0: i32) -> (i32, i32) {
    %c0_i32 = arith.constant 0 : i32
    %c0_i32_0 = arith.constant 0 : i32
    %c0_i32_1 = arith.constant 0 : i32
    return %c0_i32, %c0_i32_0 : i32, i32
  }
  func.func @transform_5(%arg0: i32) -> (i32, i32) {
    %c0_i32 = arith.constant 0 : i32
    %c0_i32_0 = arith.constant 0 : i32
    %c0_i32_1 = arith.constant 0 : i32
    return %c0_i32, %c0_i32_0 : i32, i32
  }
  func.func @transform_6(%arg0: i32) -> (i32, i32) {
    %c0_i32 = arith.constant 0 : i32
    %c0_i32_0 = arith.constant 0 : i32
    %c0_i32_1 = arith.constant 0 : i32
    return %c0_i32, %c0_i32_0 : i32, i32
  }
  func.func @transform_7(%arg0: i32) -> (i32, i32) {
    %c0_i32 = arith.constant 0 : i32
    %c0_i32_0 = arith.constant 0 : i32
    %c0_i32_1 = arith.constant 0 : i32
    return %c0_i32, %c0_i32_0 : i32, i32
  }
  func.func @transform_8(%arg0: i32) -> (i32, i32) {
    %c0_i32 = arith.constant 0 : i32
    %c0_i32_0 = arith.constant 0 : i32
    %c0_i32_1 = arith.constant 0 : i32
    return %c0_i32, %c0_i32_0 : i32, i32
  }
  func.func @transform_9(%arg0: i32) -> (i32, i32, i32) {
    %c0_i32 = arith.constant 0 : i32
    %c0_i32_0 = arith.constant 0 : i32
    %c0_i32_1 = arith.constant 0 : i32
    %c0_i32_2 = arith.constant 0 : i32
    return %c0_i32, %c0_i32_0, %c0_i32_1 : i32, i32, i32
  }
  func.func @transform_10(%arg0: i32) -> (i32, i32) {
    %c0_i32 = arith.constant 0 : i32
    %c0_i32_0 = arith.constant 0 : i32
    %c0_i32_1 = arith.constant 0 : i32
    return %c0_i32, %c0_i32_0 : i32, i32
  }
  func.func @transform_11(%arg0: i32) -> (i32, i32) {
    %c0_i32 = arith.constant 0 : i32
    %c0_i32_0 = arith.constant 0 : i32
    %c0_i32_1 = arith.constant 0 : i32
    return %c0_i32, %c0_i32_0 : i32, i32
  }
  func.func @transform_12(%arg0: i32) -> (i32, i32) {
    %c0_i32 = arith.constant 0 : i32
    %c0_i32_0 = arith.constant 0 : i32
    %c0_i32_1 = arith.constant 0 : i32
    return %c0_i32, %c0_i32_0 : i32, i32
  }
  func.func @transform_13(%arg0: i32) -> (i32, i32) {
    %c0_i32 = arith.constant 0 : i32
    %c0_i32_0 = arith.constant 0 : i32
    %c0_i32_1 = arith.constant 0 : i32
    return %c0_i32, %c0_i32_0 : i32, i32
  }
  func.func @transform_14(%arg0: i32) -> (i32, i32) {
    %c0_i32 = arith.constant 0 : i32
    %c0_i32_0 = arith.constant 0 : i32
    %c0_i32_1 = arith.constant 0 : i32
    return %c0_i32, %c0_i32_0 : i32, i32
  }
  func.func @transform_15(%arg0: i32) -> (i32, i32, i32) {
    %c0_i32 = arith.constant 0 : i32
    %c0_i32_0 = arith.constant 0 : i32
    %c0_i32_1 = arith.constant 0 : i32
    return %arg0, %c0_i32, %c0_i32_0 : i32, i32, i32
  }
  func.func @transform_16(%arg0: i32) -> (i32, i32, i32) {
    %c0_i32 = arith.constant 0 : i32
    %c0_i32_0 = arith.constant 0 : i32
    %c0_i32_1 = arith.constant 0 : i32
    return %arg0, %c0_i32, %c0_i32_0 : i32, i32, i32
  }
}

</mosaic_0001>

<bundles_post_ra>
// kernel: lenet5_forward.1
= control target key start
LH: loop header
LB: loop body
LE: loop exit
PB: predicated region body
PF: predicated region fallthrough
CT: control target
= control target key end

     0   :  { %s4803_s0 = inlined_call_operand.vmem [shape: f32[2,32,96], index: 0, kind: input, shape index: {}]   ;;  %s4804_s1 = inlined_call_operand.vmem [shape: bf16[5,96,168], index: 1, kind: input, shape index: {}]   ;;  %s4805_s2 = inlined_call_operand.vmem [shape: f32[1,168], index: 2, kind: input, shape index: {}]   ;;  %s4806_s3 = inlined_call_operand.vmem [shape: bf16[5,84,160], index: 3, kind: input, shape index: {}]   ;;  %s4807_s4 = inlined_call_operand.vmem [shape: f32[1,160], index: 4, kind: input, shape index: {}]   ;;  %s4808_s5 = inlined_call_operand.vmem [shape: bf16[14,28], index: 5, kind: input, shape index: {}]   ;;  %s4809_s6 = inlined_call_operand.vmem [shape: bf16[168,84], index: 6, kind: input, shape index: {}]   ;;  %s4810_s7 = inlined_call_operand.vmem [shape: bf16[5,10], index: 7, kind: input, shape index: {}]   ;;  %s4811_s8 = inlined_call_operand.vmem [shape: bf16[160,80], index: 8, kind: input, shape index: {}]   ;;  %s4812_s9 = inlined_call_operand.vmem [shape: bf16[5,80,120], index: 9, kind: input, shape index: {}]   ;;  %s4813_s10 = inlined_call_operand.vmem [shape: f32[1,120], index: 10, kind: input, shape index: {}]   ;;  %s4814_s11 = inlined_call_operand.vmem [shape: bf16[120,84], index: 11, kind: input, shape index: {}]   ;;  %s4815_s12 = inlined_call_operand.vmem [shape: f32[1,84], index: 12, kind: input, shape index: {}]   ;;  %s4816_s13 = inlined_call_operand.vmem [shape: bf16[84,2], index: 13, kind: input, shape index: {}]   ;;  %s4817_s14 = inlined_call_operand.vmem [shape: f32[1,2], index: 14, kind: input, shape index: {}]   ;;  %s4818_s15 = inlined_call_operand.hbm [shape: f32[2,1,2], index: 15, kind: output, shape index: {0}]   ;;  %s4819_s16 = inlined_call_operand.vmem [shape: f32[2,5,80], index: 16, kind: output, shape index: {1}]  }
   0x1   :  { %4829 = sst [smem:[#allocation12_spill]] %s4803_s0 }
   0x2   :  { %4830 = sst [smem:[#allocation13_spill]] %s4815_s12 }
   0x3   :  { %4831 = sst [smem:[#allocation14_spill]] %s4817_s14 }
   0x4   :  { %4832 = sst [smem:[#allocation15_spill]] %s4818_s15 }
   0x5   :  { %22 = vsyncpa [#allocation3], 0 }
   0x6   :  { %24 = vsyncpa [#allocation3 + $0x1], 0  ;;  %s3980_s21 = smov 0   ;;  %s3982_s22 = smov 0  }
   0x7   :  { %s3984_s23 = smov 0   ;;  %s3986_s24 = smov 0  }
   0x8 LB: > { %4833 = sst [smem:[#allocation5_spill]] %s3877_s21  ;;  %s4001_s25 = sadd.s32 4294967295, %s3889_s24   ;;  %s3889_s24 = sphi %s3986_s24, %s4850_s24   ;;  %s3885_s23 = sphi %s3984_s23, %s4852_s23   ;;  %s3881_s22 = sphi %s3982_s22, %s4854_s22   ;;  %s3877_s21 = sphi %s3980_s21, %s4853_s21  }
   0x9   : > { %4834 = sst [smem:[#allocation6_spill]] %s3885_s23  ;;  %s3042_s26 = sadd.s32 4294967294, %s3889_s24  }
   0xa   : > { %4835 = sst [smem:[#allocation7_spill]] %s3889_s24  ;;  %s4005_s27 = sadd.s32 1, %s3889_s24  }
   0xb   : > { %4836 = sst [smem:[#allocation8_spill]] %s4005_s27  ;;  %s357_s28 = sadd.s32 1, %s3885_s23 }
   0xc   : > { %s354_s29 = ssub.s32 %s3889_s24, %s4005_s27  ;;  %p367_p0 = scmp.ne.s32.totalorder %s3885_s23, %s3881_s22 }
   0xd   : > { %p355_p1 = scmp.eq.s32.totalorder %s354_s29, 0  ;;  %p368_p2 = scmp.eq.s32.totalorder %s4001_s25, 1 }
   0xe   : > { %p373_p3 = scmp.ne.s32.totalorder %s3881_s22, %s3877_s21  ;;  %p374_p4 = scmp.eq.s32.totalorder %s3042_s26, 1 }
   0xf   : > { %s4016_s30 = scalar_select %p355_p1, %s3885_s23, %s357_s28  }
  0x10   : > { %p4018_p5 = por %p368_p2, %p367_p0  ;;  %p4022_p6 = por %p374_p4, %p373_p3 }
  0x11   : > { %4837 = sst [smem:[#allocation9_spill]] %s4016_s30  ;;  %p3045_p7 = scmp.ge.s32.totalorder %s3889_s24, 1 }
  0x12   : > { %s4838_s0 = scalar_select %p4018_p5, 1, 0 }
  0x13   : > { %s4840_s17 = scalar_select %p4022_p6, 1, 0 }
  0x14   : > { %4839 = sst [smem:[#allocation10_spill]] %s4838_s0  ;;  %p468_p8 = scmp.lt.s32.totalorder %s3889_s24, 3 }
  0x15   : > { %4841 = sst [smem:[#allocation11_spill]] %s4840_s17 }
  0x16   : > { %p469_p9 = pnand %p3045_p7, %p468_p8 }
  0x17   : > { %p521_p10 = scmp.lt.s32.totalorder (!%p469_p9), %s4001_s25, 1  ;;  %s4842_s19 = sld [smem:[#allocation12_spill]] (!%p469_p9) }
  0x18   : > { %472 = sbr.rel (%p469_p9) target bundleno = 2036 (0x7f4), region = 80  ;;  %s4843_s24 = sld [smem:[#allocation13_spill]] (!%p469_p9) }
  0x19   : > { %s4844_s30 = sld [smem:[#allocation14_spill]] (!%p469_p9) }
  0x1a   : > { %s4846_s26 = sld [smem:[#allocation15_spill]] (!%p469_p9) }
  0x1d   : > { %v3593_v0 = vld [vmem:[%s4804_s1 + $0xb4] ss:$8 sps:$4 sm:$0xff]   ;;  %v3891_v2 = vmov 0   ;;  %v3597_v3 = vld [vmem:[%s4804_s1 + $0xb0] ss:$8 sps:$4 sm:$0xff]   ;;  %s4059_s18 = scalar_select %p521_p10, %s4001_s25, 1 }
  0x1e   : > { %v3595_v1 = vld [vmem:[%s4804_s1 + $0x54] ss:$8 sps:$4 sm:$0xff]   ;;  %677 = vmatprep.mubr.bf16.mxu0 %v3891_v2  ;;  %794 = vmatprep.mubr.bf16.mxu1 %v3891_v2  ;;  %v3598_v4 = vld [vmem:[%s4804_s1 + $0x50] ss:$8 sps:$4 sm:$0xff]   ;;  %v3599_v5 = vld [vmem:[%s4804_s1 + $0xa4] ss:$8 sps:$4 sm:$0xff]  }
  0x1f   : > { %649 = vmatprep.subr.bf16.mxu0 %v3593_v0  ;;  %766 = vmatprep.subr.bf16.mxu1 %v3595_v1  ;;  %v3601_v6 = vld [vmem:[%s4804_s1 + $0x44] ss:$8 sps:$4 sm:$0xff]   ;;  %v3603_v7 = vld [vmem:[%s4804_s1 + $0xa0] ss:$8 sps:$4 sm:$0xff]   ;;  %v3605_v9 = vld [vmem:[%s4804_s1 + $0x94] ss:$8 sps:$4 sm:$0xff]  }
  0x20   : > { %650 = vmatpush1.bf16.msra.mxu0 %v3597_v3  ;;  %767 = vmatpush1.bf16.msra.mxu1 %v3598_v4  ;;  %v3604_v8 = vld [vmem:[%s4804_s1 + $0x40] ss:$8 sps:$4 sm:$0xff]   ;;  %v3607_v10 = vld [vmem:[%s4804_s1 + $0x34] ss:$8 sps:$4 sm:$0xff]   ;;  %v3609_v11 = vld [vmem:[%s4804_s1 + $0x90] ss:$8 sps:$4 sm:$0xff]  }
  0x21   : > { %651 = vmatprep.subr.bf16.mxu0 %v3599_v5  ;;  %768 = vmatprep.subr.bf16.mxu1 %v3601_v6  ;;  %v3610_v12 = vld [vmem:[%s4804_s1 + $0x30] ss:$8 sps:$4 sm:$0xff]   ;;  %v3611_v13 = vld [vmem:[%s4804_s1 + $0x84] ss:$8 sps:$4 sm:$0xff]   ;;  %s3398_s29 = sshll.u32 %s4059_s18, 5  ;;  %vm638_vm1 = vcmask 785408  }
  0x22   : > { %v3613_v14 = vld [vmem:[%s4804_s1 + $0x24] ss:$8 sps:$4 sm:$0xff]   ;;  %v3615_v15 = vld [vmem:[%s4804_s1 + $0x80] ss:$8 sps:$4 sm:$0xff]   ;;  %v3617_v17 = vld [vmem:[%s4804_s1 + $0x74] ss:$8 sps:$4 sm:$0xff]   ;;  %s525_s20 = scalar_lea.vmem %s4842_s19, %s3398_s29 }
  0x23   : > { %v3616_v16 = vld [vmem:[%s4804_s1 + $0x20] ss:$8 sps:$4 sm:$0xff]   ;;  %v3619_v18 = vld [vmem:[%s4804_s1 + $0x14] ss:$8 sps:$4 sm:$0xff]   ;;  %v3621_v19 = vld [vmem:[%s4804_s1 + $0x70] ss:$8 sps:$4 sm:$0xff]  }
  0x24   : > { %652 = vmatpush1.bf16.msra.mxu0 %v3603_v7  ;;  %769 = vmatpush1.bf16.msra.mxu1 %v3604_v8  ;;  %v3622_v20 = vld [vmem:[%s4804_s1 + $0x10] ss:$8 sps:$4 sm:$0xff]   ;;  %v3623_v21 = vld [vmem:[%s4804_s1 + $0x64] ss:$8 sps:$4 sm:$0xff]   ;;  %v3627_v31 = vld [vmem:[%s4804_s1 + $0x60] ss:$8 sps:$4 sm:$0xff]  }
  0x25   : > { %653 = vmatprep.subr.bf16.mxu0 %v3605_v9  ;;  %770 = vmatprep.subr.bf16.mxu1 %v3607_v10  ;;  %v3625_v22 = vld [vmem:[%s4804_s1 + $0x4] ss:$8 sps:$4 sm:$0xff]   ;;  %v533_v25 = vld [vmem:[%s525_s20 + $0x10] sm:$0xff]  ;;  %v534_v26 = vld [vmem:[%s525_s20 + $0x18] sm:$0xff]  ;;  %vm562_vm0 = vsmask.f32 7424 }
  0x26   : > { %v531_v23 = vld [vmem:[%s525_s20] sm:$0xff]  ;;  %v532_v24 = vld [vmem:[%s525_s20 + $0x8] sm:$0xff]  ;;  %v4106_v28 = vpack.c.bf16 %v534_v26, %v533_v25  ;;  %v3631_v35 = vld [vmem:[%s4804_s1 + $0x114] ss:$8 sps:$4 sm:$0xff]   ;;  %vm830_vm2 = vcmask 1046528   ;;  %vm1122_vm4 = vcmask 1045504  }
  0x27   : > { %v4104_v27 = vpack.c.bf16 %v532_v24, %v531_v23  ;;  %v3628_v32 = vld [vmem:[%s4804_s1] ss:$8 sps:$4 sm:$0xff]   ;;  %v3634_v36 = vld [vmem:[%s4804_s1 + $0x174] ss:$8 sps:$4 sm:$0xff]   ;;  %v3629_v39 = vld [vmem:[%s4804_s1 + $0x110] ss:$8 sps:$4 sm:$0xff]  }
  0x28   : > { %654 = vmatpush1.bf16.msra.mxu0 %v3609_v11  ;;  %771 = vmatpush1.bf16.msra.mxu1 %v3610_v12  ;;  %v571_v33 = vshll.u32 %v4106_v28, 16  ;;  %v3632_v40 = vld [vmem:[%s4804_s1 + $0x170] ss:$8 sps:$4 sm:$0xff]   ;;  %v3637_v42 = vld [vmem:[%s4804_s1 + $0x104] ss:$8 sps:$4 sm:$0xff]   ;;  %v575_v45 = vshrl.u32 %v4106_v28, 16 }
  0x29   : > { %655 = vmatprep.subr.bf16.mxu0 %v3611_v13  ;;  %772 = vmatprep.subr.bf16.mxu1 %v3613_v14  ;;  %v564_v29 = vshrl.u32 %v4104_v27, 16  ;;  %v566_v30 = vshll.u32 %v4104_v27, 16  ;;  %v3640_v43 = vld [vmem:[%s4804_s1 + $0x164] ss:$8 sps:$4 sm:$0xff]   ;;  %v3635_v44 = vld [vmem:[%s4804_s1 + $0x100] ss:$8 sps:$4 sm:$0xff]  }
  0x2a   : > { %v573_v37 = vrot.slane %v571_v33, 1  ;;  %v3638_v46 = vld [vmem:[%s4804_s1 + $0x160] ss:$8 sps:$4 sm:$0xff]   ;;  %v3643_v47 = vld [vmem:[%s4804_s1 + $0xf4] ss:$8 sps:$4 sm:$0xff]   ;;  %v979_v60 = vrot.slane %v571_v33, 2 }
  0x2b   : > { %v568_v34 = vrot.slane %v566_v30, 1  ;;  %v3646_v48 = vld [vmem:[%s4804_s1 + $0x154] ss:$8 sps:$4 sm:$0xff]   ;;  %v3641_v49 = vld [vmem:[%s4804_s1 + $0xf0] ss:$8 sps:$4 sm:$0xff]   ;;  %v975_v58 = vrot.slane %v564_v29, 1 }
  0x2c   : > { %656 = vmatpush1.bf16.msra.mxu0 %v3615_v15  ;;  %773 = vmatpush1.bf16.msra.mxu1 %v3616_v16  ;;  %v577_v50 = vor.u32 %v575_v45, %v573_v37  ;;  %v3644_v51 = vld [vmem:[%s4804_s1 + $0x150] ss:$8 sps:$4 sm:$0xff]   ;;  %v3649_v52 = vld [vmem:[%s4804_s1 + $0xe4] ss:$8 sps:$4 sm:$0xff]   ;;  %v3647_v54 = vld [vmem:[%s4804_s1 + $0xe0] ss:$8 sps:$4 sm:$0xff]  }
  0x2d   : > { %657 = vmatprep.subr.bf16.mxu0 %v3617_v17  ;;  %774 = vmatprep.subr.bf16.mxu1 %v3619_v18  ;;  %v569_v38 = vor.u32 %v568_v34, %v564_v29  ;;  %v3652_v53 = vld [vmem:[%s4804_s1 + $0x144] ss:$8 sps:$4 sm:$0xff]   ;;  %v3650_v55 = vld [vmem:[%s4804_s1 + $0x140] ss:$8 sps:$4 sm:$0xff]   ;;  %v3655_v56 = vld [vmem:[%s4804_s1 + $0xd4] ss:$8 sps:$4 sm:$0xff]  }
  0x2e   : > { %v3658_v57 = vld [vmem:[%s4804_s1 + $0x134] ss:$8 sps:$4 sm:$0xff]   ;;  %v976_v59 = vrot.slane %v566_v30, 2  ;;  %vm974_vm3 = vsmask.f32 6400  ;;  %v831_v62 = vrot.slane %v4104_v27, 1 }
  0x2f   : > { %v574_v41 = vsel %vm562_vm0, %v569_v38, %v573_v37  ;;  %v3653_v61 = vld [vmem:[%s4804_s1 + $0xd0] ss:$8 sps:$4 sm:$0xff]   ;;  %v978_v63 = vrot.slane %v575_v45, 1  ;;  %v832_v1 = vrot.slane %v4106_v28, 1  ;;  %v3661_v3 = vld [vmem:[%s4804_s1 + $0xc4] ss:$8 sps:$4 sm:$0xff]  }
  0x30   : > { %658 = vmatpush1.bf16.msra.mxu0 %v3621_v19  ;;  %775 = vmatpush1.bf16.msra.mxu1 %v3622_v20  ;;  %v3656_v0 = vld [vmem:[%s4804_s1 + $0x130] ss:$8 sps:$4 sm:$0xff]   ;;  %v3664_v4 = vld [vmem:[%s4804_s1 + $0x124] ss:$8 sps:$4 sm:$0xff]   ;;  %v3659_v5 = vld [vmem:[%s4804_s1 + $0xc0] ss:$8 sps:$4 sm:$0xff]   ;;  %v977_v8 = vor.u32 %v976_v59, %v975_v58 }
  0x31   : > { %659 = vmatprep.subr.bf16.mxu0 %v3623_v21  ;;  %776 = vmatprep.subr.bf16.mxu1 %v3625_v22  ;;  %v3662_v6 = vld [vmem:[%s4804_s1 + $0x120] ss:$8 sps:$4 sm:$0xff]   ;;  %v3667_v7 = vld [vmem:[%s4804_s1 + $0x1d4] ss:$8 sps:$4 sm:$0xff]   ;;  %v980_v9 = vor.u32 %v979_v60, %v978_v63  ;;  %v3665_v10 = vld [vmem:[%s4804_s1 + $0x1d0] ss:$8 sps:$4 sm:$0xff]   ;;  %v833_v12 = vsel %vm830_vm2, %v831_v62, %v832_v1 }
  0x32   : > { %v3670_v11 = vld [vmem:[%s4804_s1 + $0x1c4] ss:$8 sps:$4 sm:$0xff]   ;;  %v3668_v14 = vld [vmem:[%s4804_s1 + $0x1c0] ss:$8 sps:$4 sm:$0xff]   ;;  %v3673_v15 = vld [vmem:[%s4804_s1 + $0x1b4] ss:$8 sps:$4 sm:$0xff]  }
  0x33   : > { %v981_v13 = vsel %vm974_vm3, %v977_v8, %v980_v9  ;;  %v3671_v16 = vld [vmem:[%s4804_s1 + $0x1b0] ss:$8 sps:$4 sm:$0xff]   ;;  %v3676_v17 = vld [vmem:[%s4804_s1 + $0x1a4] ss:$8 sps:$4 sm:$0xff]   ;;  %v3674_v18 = vld [vmem:[%s4804_s1 + $0x1a0] ss:$8 sps:$4 sm:$0xff]  }
  0x34   : > { %660 = vmatpush1.bf16.msra.mxu0 %v3627_v31  ;;  %777 = vmatpush1.bf16.msra.mxu1 %v3628_v32  ;;  %v3679_v19 = vld [vmem:[%s4804_s1 + $0x194] ss:$8 sps:$4 sm:$0xff]   ;;  %v3677_v20 = vld [vmem:[%s4804_s1 + $0x190] ss:$8 sps:$4 sm:$0xff]   ;;  %v3682_v21 = vld [vmem:[%s4804_s1 + $0x184] ss:$8 sps:$4 sm:$0xff]  }
  0x35   : > { %904 = vmatprep.subr.bf16.mxu0 %v3631_v35  ;;  %1052 = vmatprep.subr.bf16.mxu1 %v3634_v36  ;;  %v1123_v22 = vrot.slane %v4104_v27, 2  ;;  %v1124_v23 = vrot.slane %v4106_v28, 2  ;;  %v3680_v24 = vld [vmem:[%s4804_s1 + $0x180] ss:$8 sps:$4 sm:$0xff]   ;;  %vm1292_vm5 = vcmask 228352   ;;  %vm1436_vm6 = vcmask 1043456  }
  0x36   : > { %vm1571_vm7 = vcmask 1041408   ;;  %vm1432_vm8 = vcmask 326656   ;;  %vm1567_vm9 = vcmask 687104   ;;  %vm2129_vm10 = vcmask 1044480   ;;  %s3048_s14 = sshll.u32 %s4059_s18, 3  ;;  %s3395_s18 = sshll.u32 %s4001_s25, 4 }
  0x37   : > { %3073 = vmatmul.mubr.msk.bf16.vlgmr.msra.gmra.mxu0 %vm638_vm1, %v574_v41  ;;  %3087 = vmatmul.mubr.msk.bf16.vlgmr.msra.gmra.mxu1 %vm638_vm1, %v4104_v27  ;;  %v1125_v25 = vsel %vm1122_vm4, %v1123_v22, %v1124_v23  ;;  %vm2125_vm11 = vcmask 80896   ;;  %vm2259_vm12 = vcmask 261120   ;;  %vm3893_vm13 = vmmov 0   ;;  %s529_s0 = scalar_lea.vmem %s4819_s16, %s3048_s14  ;;  %s4762_s28 = scalar_lea.hbm %s4846_s26, %s3395_s18 }
  0x38   : > { %905 = vmatpush1.bf16.msra.mxu0 %v3629_v39  ;;  %1053 = vmatpush1.bf16.msra.mxu1 %v3632_v40  ;;  %vm2303_vm14 = vcmask 651264   ;;  %vm2347_vm15 = vcmask 654336   ;;  %vm2801_vm0 = vcmask 982016   ;;  %s3894_s14 = smov [#allocation2]  }
  0x39   : > { %906 = vmatprep.subr.bf16.mxu0 %v3637_v42  ;;  %1054 = vmatprep.subr.bf16.mxu1 %v3640_v43  ;;  %s3833_s15 = sshll.u32 %s3894_s14, 4  ;;  %s3834_s15 = int_to_ptr.vmem [resolvable:$false] %s3833_s15 }
  0x3a   : > { %687 = vmatprep.mubr.bf16.mxu0 %v3891_v2  ;;  %804 = vmatprep.mubr.bf16.mxu1 %v3891_v2 }
  0x3c   : > { %907 = vmatpush1.bf16.msra.mxu0 %v3635_v44  ;;  %1055 = vmatpush1.bf16.msra.mxu1 %v3638_v46 }
  0x3d   : > { %908 = vmatprep.subr.bf16.mxu0 %v3643_v47  ;;  %1056 = vmatprep.subr.bf16.mxu1 %v3646_v48 }
  0x3f   : > { %3074 = vmatmul.mubr.msk.bf16.gmra.mxu0 %vm638_vm1, %v577_v50  ;;  %3088 = vmatmul.mubr.msk.bf16.gmra.mxu1 %vm638_vm1, %v4106_v28 }
  0x40   : > { %909 = vmatpush1.bf16.msra.mxu0 %v3641_v49  ;;  %1057 = vmatpush1.bf16.msra.mxu1 %v3644_v51 }
  0x41   : > { %910 = vmatprep.subr.bf16.mxu0 %v3649_v52  ;;  %1058 = vmatprep.subr.bf16.mxu1 %v3652_v53 }
  0x42   : > { %932 = vmatprep.mubr.bf16.mxu0 %v3891_v2  ;;  %1080 = vmatprep.mubr.bf16.mxu1 %v3891_v2 }
  0x44   : > { %911 = vmatpush1.bf16.msra.mxu0 %v3647_v54  ;;  %1059 = vmatpush1.bf16.msra.mxu1 %v3650_v55  ;;  %v1255_v55 = vlaneseq }
  0x45   : > { %912 = vmatprep.subr.bf16.mxu0 %v3655_v56  ;;  %1060 = vmatprep.subr.bf16.mxu1 %v3658_v57 }
  0x46   : > { %v4255_v59 = vshrl.u32 %v1255_v55, 7 }
  0x48   : > { %913 = vmatpush1.bf16.msra.mxu0 %v3653_v61  ;;  %1061 = vmatpush1.bf16.msra.mxu1 %v3656_v0  ;;  %v1257_v8 = vsub.s32 0, %v4255_v59 }
  0x49   : > { %914 = vmatprep.subr.bf16.mxu0 %v3661_v3  ;;  %1062 = vmatprep.subr.bf16.mxu1 %v3664_v4 }
  0x4c   : > { %915 = vmatpush1.bf16.msra.mxu0 %v3659_v5  ;;  %1063 = vmatpush1.bf16.msra.mxu1 %v3662_v6 }
  0x4d   : > { %1196 = vmatprep.subr.bf16.mxu0 %v3667_v7 }
  0x4f   : > { %3113 = vmatmul.mubr.msk.bf16.vlgmr.msra.gmra.mxu0 %vm638_vm1, %v833_v12  ;;  %3139 = vmatmul.mubr.msk.bf16.vlgmr.msra.gmra.mxu1 %vm638_vm1, %v981_v13 }
  0x50   : > { %1197 = vmatpush1.bf16.msra.mxu0 %v3665_v10  ;;  %942 = vmatprep.mubr.bf16.mxu0 %v3891_v2 }
  0x51   : > { %1198 = vmatprep.subr.bf16.mxu0 %v3670_v11  ;;  %1090 = vmatprep.mubr.bf16.mxu1 %v3891_v2 }
  0x54   : > { %1199 = vmatpush1.bf16.msra.mxu0 %v3668_v14  ;;  %v1253_v14 = vld [vmem:[%s4805_s2] sm:$0x3] }
  0x55   : > { %1200 = vmatprep.subr.bf16.mxu0 %v3673_v15 }
  0x57   : > { %3114 = vmatmul.mubr.msk.bf16.gmra.mxu0 %vm638_vm1, %v832_v1  ;;  %3140 = vmatmul.mubr.msk.bf16.gmra.mxu1 %vm638_vm1, %v980_v9 }
  0x58   : > { %1201 = vmatpush1.bf16.msra.mxu0 %v3671_v16  ;;  %1224 = vmatprep.mubr.bf16.mxu0 %v3891_v2 }
  0x59   : > { %1202 = vmatprep.subr.bf16.mxu0 %v3676_v17  ;;  %1335 = vmatprep.mubr.bf16.mxu1 %v3891_v2  ;;  %v1261_v17 = vsub.s32 1, %v4255_v59 }
  0x5c   : > { %1203 = vmatpush1.bf16.msra.mxu0 %v3674_v18 }
  0x5d   : > { %1204 = vmatprep.subr.bf16.mxu0 %v3679_v19 }
  0x60   : > { %1205 = vmatpush1.bf16.msra.mxu0 %v3677_v20 }
  0x61   : > { %1206 = vmatprep.subr.bf16.mxu0 %v3682_v21 }
  0x64   : > { %1207 = vmatpush1.bf16.msra.mxu0 %v3680_v24 }
  0x67   : > { %3165 = vmatmul.mubr.msk.bf16.vlgmr.msra.gmra.mxu0 %vm638_vm1, %v1125_v25  ;;  %v1258_v25 = vrot.slane %v1253_v14, %v1257_v8 }
  0x68   : > { %1234 = vmatprep.mubr.bf16.mxu0 %v3891_v2 }
  0x6f   : > { %3166 = vmatmul.mubr.msk.bf16.gmra.mxu0 %vm638_vm1, %v1124_v23  ;;  %vm2941_vm1 = vcmask 8192  }
  0x70   : > { %1610 = vmatprep.mubr.bf16.mxu0 %v3891_v2 }
  0xf7   : > { %v679_v26 = vpop.f32.mrf.mxu0  ;;  %v796_v27 = vpop.f32.mrf.mxu1 }
  0xf8   : > { %v797_v15 = vadd.f32 %v796_v27, %v679_v26  ;;  %v1262_v26 = vrot.slane %v1253_v14, %v1261_v17  ;;  %v3694_v14 = vld [vmem:[%s4809_s6 + $0x40] sm:$0xff]  }
  0xf9   : > { %v681_v28 = vpop.f32.mrf.mxu0  ;;  %v798_v30 = vpop.f32.mrf.mxu1 }
  0xfa   : > { %v799_v1 = vadd.f32 %v798_v30, %v681_v28 }
  0xfb   : > { %v683_v29 = vpop.f32.mrf.mxu0  ;;  %v800_v32 = vpop.f32.mrf.mxu1 }
  0xfc   : > { %v801_v6 = vadd.f32 %v800_v32, %v683_v29 }
  0xfd   : > { %v685_v31 = vpop.f32.mrf.mxu0  ;;  %v802_v34 = vpop.f32.mrf.mxu1 }
  0xfe   : > { %v803_v61 = vadd.f32 %v802_v34, %v685_v31 }
  0xff   : > { %v689_v33 = vpop.f32.mrf.mxu0  ;;  %v806_v36 = vpop.f32.mrf.mxu1 }
 0x100   : > { %v807_v57 = vadd.f32 %v806_v36, %v689_v33 }
 0x101   : > { %v691_v35 = vpop.f32.mrf.mxu0  ;;  %v808_v38 = vpop.f32.mrf.mxu1 }
 0x102   : > { %v809_v62 = vadd.f32 %v808_v38, %v691_v35 }
 0x103   : > { %v693_v37 = vpop.f32.mrf.mxu0  ;;  %v810_v40 = vpop.f32.mrf.mxu1 }
 0x104   : > { %v811_v3 = vadd.f32 %v810_v40, %v693_v37 }
 0x105   : > { %v695_v39 = vpop.f32.mrf.mxu0  ;;  %v812_v43 = vpop.f32.mrf.mxu1 }
 0x106   : > { %v813_v10 = vadd.f32 %v812_v43, %v695_v39 }
 0x10f   : > { %v934_v41 = vpop.f32.mrf.mxu0  ;;  %v1082_v45 = vpop.f32.mrf.mxu1 }
 0x110   : > { %v953_v23 = vadd.f32 %v934_v41, %v797_v15  ;;  %v3231_v15 = vld [vmem:[%s4806_s3 + $0x100] sm:$0x33] }
 0x111   : > { %v936_v42 = vpop.f32.mrf.mxu0  ;;  %v1084_v47 = vpop.f32.mrf.mxu1 }
 0x112   : > { %v954_v11 = vadd.f32 %v936_v42, %v799_v1  ;;  %v1101_v38 = vadd.f32 %v1082_v45, %v953_v23  ;;  %v3684_v1 = vld [vmem:[%s4809_s6 + $0x38] sm:$0xff]  }
 0x113   : > { %v938_v44 = vpop.f32.mrf.mxu0  ;;  %v1086_v49 = vpop.f32.mrf.mxu1  ;;  %v3704_v23 = vld [vmem:[%s4806_s3 + $0x9c] ss:$8 sps:$4 sm:$0xff]  }
 0x114   : > { %v955_v16 = vadd.f32 %v938_v44, %v801_v6  ;;  %v1102_v29 = vadd.f32 %v1084_v47, %v954_v11  ;;  %v3688_v6 = vld [vmem:[%s4809_s6 + $0x18] sm:$0xff]   ;;  %v3692_v11 = vld [vmem:[%s4809_s6 + $0x50] ss:$0 sps:$4 sm:$0xff]  }
 0x115   : > { %v940_v46 = vpop.f32.mrf.mxu0  ;;  %v1088_v51 = vpop.f32.mrf.mxu1 }
 0x116   : > { %v956_v4 = vadd.f32 %v940_v46, %v803_v61  ;;  %v1103_v33 = vadd.f32 %v1086_v49, %v955_v16  ;;  %v3243_v16 = vcombine.high %v3231_v15, %v3231_v15 }
 0x117   : > { %v944_v48 = vpop.f32.mrf.mxu0  ;;  %v1092_v53 = vpop.f32.mrf.mxu1 }
 0x118   : > { %v957_v63 = vadd.f32 %v944_v48, %v807_v57  ;;  %v1104_v19 = vadd.f32 %v1088_v51, %v956_v4  ;;  %v3686_v4 = vld [vmem:[%s4809_s6 + $0x28] sm:$0xff]  }
 0x119   : > { %v946_v50 = vpop.f32.mrf.mxu0  ;;  %v1094_v58 = vpop.f32.mrf.mxu1 }
 0x11a   : > { %v958_v5 = vadd.f32 %v946_v50, %v809_v62  ;;  %v1105_v12 = vadd.f32 %v1092_v53, %v957_v63 }
 0x11b   : > { %v948_v52 = vpop.f32.mrf.mxu0  ;;  %v1096_v7 = vpop.f32.mrf.mxu1 }
 0x11c   : > { %v959_v13 = vadd.f32 %v948_v52, %v811_v3  ;;  %v1106_v20 = vadd.f32 %v1094_v58, %v958_v5  ;;  %v3685_v3 = vld [vmem:[%s4809_s6 + $0x30] sm:$0xff]   ;;  %v3687_v5 = vld [vmem:[%s4809_s6 + $0x20] sm:$0xff]  }
 0x11d   : > { %v950_v54 = vpop.f32.mrf.mxu0  ;;  %v1098_v24 = vpop.f32.mrf.mxu1 }
 0x11e   : > { %v960_v21 = vadd.f32 %v950_v54, %v813_v10  ;;  %v1107_v30 = vadd.f32 %v1096_v7, %v959_v13  ;;  %v3689_v7 = vld [vmem:[%s4809_s6 + $0x10] sm:$0xff]   ;;  %v3691_v10 = vld [vmem:[%s4809_s6] sm:$0xff]   ;;  %v3693_v13 = vld [vmem:[%s4809_s6 + $0x48] sm:$0xff]  }
 0x120   : > { %v1108_v34 = vadd.f32 %v1098_v24, %v960_v21  ;;  %v3708_v24 = vld [vmem:[%s4806_s3 + $0x88] ss:$8 sps:$4 sm:$0xff]  }
 0x127   : > { %v1226_v56 = vpop.f32.mrf.mxu0 }
 0x128   : > { %v1245_v46 = vadd.f32 %v1226_v56, %v1101_v38  ;;  %v3713_v38 = vld [vmem:[%s4806_s3 + $0xd4] ss:$8 sps:$4 sm:$0xff]  }
 0x129   : > { %v1228_v60 = vpop.f32.mrf.mxu0 }
 0x12a   : > { %v1246_v35 = vadd.f32 %v1228_v60, %v1102_v29  ;;  %v1265_v57 = vadd.f32 %v1258_v25, %v1245_v46  ;;  %v3725_v46 = vld [vmem:[%s4806_s3 + $0xb4] ss:$8 sps:$4 sm:$0xff]  }
 0x12b   : > { %v1230_v0 = vpop.f32.mrf.mxu0 }
 0x12c   : > { %v1247_v39 = vadd.f32 %v1230_v0, %v1103_v33  ;;  %v1266_v47 = vadd.f32 %v1262_v26, %v1246_v35  ;;  %v1273_v63 = vmax.f32 %v1265_v57, 0.0  ;;  %v3683_v0 = vld [vmem:[%s4808_s5] sm:$0x7f]   ;;  %v3698_v35 = vld [vmem:[%s4806_s3 + $0xf0] ss:$8 sps:$4 sm:$0xff]  }
 0x12d   : > { %v1232_v9 = vpop.f32.mrf.mxu0 }
 0x12e   : > { %v1248_v31 = vadd.f32 %v1232_v9, %v1104_v19  ;;  %v1267_v51 = vadd.f32 %v1258_v25, %v1247_v39  ;;  %v1274_v58 = vmax.f32 %v1266_v47, 0.0  ;;  %v3690_v9 = vld [vmem:[%s4809_s6 + $0x8] sm:$0xff]   ;;  %v3711_v39 = vld [vmem:[%s4806_s3 + $0xd0] ss:$8 sps:$4 sm:$0xff]  }
 0x12f   : > { %v1236_v18 = vpop.f32.mrf.mxu0  ;;  %v3720_v47 = vld [vmem:[%s4806_s3 + $0x68] ss:$8 sps:$4 sm:$0xff]  }
 0x130   : > { %v1249_v22 = vadd.f32 %v1236_v18, %v1105_v12  ;;  %v1268_v41 = vadd.f32 %v1262_v26, %v1248_v31  ;;  %v1275_v45 = vmax.f32 %v1267_v51, 0.0  ;;  %v1438_v12 = vsel %vm1436_vm6, %v3692_v11, 0  ;;  %v3192_v18 = vld [vmem:[%s4806_s3 + $0xa8] sm:$0x33] }
 0x131   : > { %v1238_v28 = vpop.f32.mrf.mxu0  ;;  %v3204_v19 = vcombine.high %v3192_v18, %v3192_v18  ;;  %v3242_v31 = vcombine.low %v3231_v15, %v3231_v15  ;;  %v3736_v11 = vld [vmem:[%s4806_s3 + $0x40] ss:$8 sps:$4 sm:$0xff]   ;;  %v3742_v15 = vld [vmem:[%s4806_s3 + $0x30] ss:$8 sps:$4 sm:$0xff]  }
 0x132   : > { %v1250_v32 = vadd.f32 %v1238_v28, %v1106_v20  ;;  %v1269_v36 = vadd.f32 %v1258_v25, %v1249_v22  ;;  %v1276_v52 = vmax.f32 %v1268_v41, 0.0  ;;  %v1283_v56 = vpack.c.bf16 %v1275_v45, %v1273_v63  ;;  %v3702_v22 = vld [vmem:[%s4806_s3 + $0x98] ss:$8 sps:$4 sm:$0xff]   ;;  %v3719_v41 = vld [vmem:[%s4806_s3 + $0xc4] ss:$8 sps:$4 sm:$0xff]  }
 0x133   : > { %v1240_v27 = vpop.f32.mrf.mxu0  ;;  %v3203_v20 = vcombine.low %v3192_v18, %v3192_v18  ;;  %3205 = vmatprep.subr.msk.bf16.mxu0 %vm1571_vm7, %v3204_v19  ;;  %v3750_v18 = vld [vmem:[%s4806_s3 + $0x24] ss:$8 sps:$4 sm:$0xff]   ;;  %v3753_v19 = vld [vmem:[%s4806_s3 + $0x174] ss:$8 sps:$4 sm:$0xff]  }
 0x134   : > { %v1251_v37 = vadd.f32 %v1240_v27, %v1107_v30  ;;  %v1270_v42 = vadd.f32 %v1262_v26, %v1250_v32  ;;  %v1277_v48 = vmax.f32 %v1269_v36, 0.0  ;;  %v1284_v62 = vpack.c.bf16 %v1276_v52, %v1274_v58  ;;  %v3707_v36 = vld [vmem:[%s4806_s3 + $0xe4] ss:$8 sps:$4 sm:$0xff]   ;;  %v3726_v52 = vld [vmem:[%s4806_s3 + $0x58] ss:$8 sps:$4 sm:$0xff]  }
 0x135   : > { %v1242_v40 = vpop.f32.mrf.mxu0  ;;  %v1573_v21 = vsel %vm1571_vm7, %v3203_v20, 0  ;;  %v1800_v27 = vsel %vm1571_vm7, %v3242_v31, 0  ;;  %v3748_v20 = vld [vmem:[%s4806_s3 + $0x20] ss:$8 sps:$4 sm:$0xff]  }
 0x136   : > { %v1271_v43 = vadd.f32 %v1258_v25, %v1251_v37  ;;  %v1252_v44 = vadd.f32 %v1242_v40, %v1108_v34  ;;  %v1278_v53 = vmax.f32 %v1270_v42, 0.0  ;;  %1583 = vmatpush1.bf16.msra.mxu0 %v1573_v21  ;;  %v3710_v25 = vld [vmem:[%s4806_s3 + $0x8c] ss:$8 sps:$4 sm:$0xff]   ;;  %v3705_v37 = vld [vmem:[%s4806_s3 + $0xe0] ss:$8 sps:$4 sm:$0xff]  }
 0x137   : > { %1584 = vmatprep.subr.bf16.mxu0 %v3704_v23  ;;  %v3700_v34 = vld [vmem:[%s4806_s3 + $0xf4] ss:$8 sps:$4 sm:$0xff]   ;;  %v3714_v42 = vld [vmem:[%s4806_s3 + $0x78] ss:$8 sps:$4 sm:$0xff]   ;;  %v3759_v23 = vld [vmem:[%s4806_s3 + $0x164] ss:$8 sps:$4 sm:$0xff]  }
 0x138   : > { %v1279_v50 = vmax.f32 %v1271_v43, 0.0  ;;  %v1272_v49 = vadd.f32 %v1262_v26, %v1252_v44  ;;  %v3716_v40 = vld [vmem:[%s4806_s3 + $0x7c] ss:$8 sps:$4 sm:$0xff]   ;;  %v3717_v43 = vld [vmem:[%s4806_s3 + $0xc0] ss:$8 sps:$4 sm:$0xff]  }
 0x139   : > { %v3722_v44 = vld [vmem:[%s4806_s3 + $0x6c] ss:$8 sps:$4 sm:$0xff]   ;;  %v3751_v21 = vld [vmem:[%s4806_s3 + $0x170] ss:$8 sps:$4 sm:$0xff]  }
 0x13a   : > { %v1285_v54 = vpack.c.bf16 %v1279_v50, %v1277_v48  ;;  %v1280_v55 = vmax.f32 %v1272_v49, 0.0  ;;  %1585 = vmatpush1.bf16.msra.mxu0 %v3702_v22  ;;  %v3723_v48 = vld [vmem:[%s4806_s3 + $0xb0] ss:$8 sps:$4 sm:$0xff]   ;;  %v3728_v49 = vld [vmem:[%s4806_s3 + $0x5c] ss:$8 sps:$4 sm:$0xff]  }
 0x13b   : > { %1586 = vmatprep.subr.bf16.mxu0 %v3710_v25  ;;  %v3281_v50 = vld [vmem:[%s4806_s3 + $0x1b0] sm:$0x33]  ;;  %v3757_v25 = vld [vmem:[%s4806_s3 + $0x160] ss:$8 sps:$4 sm:$0xff]  }
 0x13c   : > { %v1286_v60 = vpack.c.bf16 %v1280_v55, %v1278_v53  ;;  %v1298_v61 = vsel %vm1122_vm4, %v1285_v54, 0  ;;  %v3293_v51 = vcombine.high %v3281_v50, %v3281_v50  ;;  %v1492_v53 = vld [vmem:[%s4806_s3 + $0x50] sm:$0x33]  ;;  %v3292_v58 = vcombine.low %v3281_v50, %v3281_v50 }
 0x13d   : > { %v3218_v54 = vcombine.high %v1492_v53, %v1492_v53  ;;  %v3756_v22 = vld [vmem:[%s4806_s3 + $0x14] ss:$8 sps:$4 sm:$0xff]  }
 0x13e   : > { %3168 = vmatprep.subr.msk.bf16.mxu1 %vm1122_vm4, %v1286_v60  ;;  %1587 = vmatpush1.bf16.msra.mxu0 %v3708_v24  ;;  %v3754_v24 = vld [vmem:[%s4806_s3 + $0x10] ss:$8 sps:$4 sm:$0xff]  }
 0x13f   : > { %1316 = vmatpush1.bf16.msra.mxu1 %v1298_v61  ;;  %1588 = vmatprep.subr.bf16.mxu0 %v3716_v40  ;;  %v3774_v40 = vld [vmem:[%s4806_s3 + $0x118] ss:$8 sps:$4 sm:$0xff]  }
 0x140   : > { %1317 = vmatprep.subr.bf16.mxu1 %v1284_v62 }
 0x142   : > { %1589 = vmatpush1.bf16.msra.mxu0 %v3714_v42  ;;  %v3777_v42 = vld [vmem:[%s4806_s3 + $0x108] ss:$8 sps:$4 sm:$0xff]  }
 0x143   : > { %1318 = vmatpush1.bf16.msra.mxu1 %v1283_v56  ;;  %1590 = vmatprep.subr.bf16.mxu0 %v3722_v44  ;;  %v2050_v56 = vsel %vm1571_vm7, %v3292_v58, 0 }
 0x144   : > { %1440 = vmatprep.subr.bf16.mxu1 %v3891_v2 }
 0x146   : > { %3169 = vmatmul.mubr.msk.bf16.vlgmr.msra.gmra.mxu1 %vm1292_vm5, %v3683_v0  ;;  %1591 = vmatpush1.bf16.msra.mxu0 %v3720_v47  ;;  %v3734_v0 = vld [vmem:[%s4806_s3 + $0x1a4] ss:$8 sps:$4 sm:$0xff]  }
 0x147   : > { %1441 = vmatpush1.bf16.msra.mxu1 %v3684_v1  ;;  %1592 = vmatprep.subr.bf16.mxu0 %v3728_v49  ;;  %v3217_v1 = vcombine.low %v1492_v53, %v1492_v53 }
 0x148   : > { %1442 = vmatprep.subr.bf16.mxu1 %v3891_v2 }
 0x14a   : > { %1593 = vmatpush1.bf16.msra.mxu0 %v3726_v52 }
 0x14b   : > { %1443 = vmatpush1.bf16.msra.mxu1 %v3685_v3  ;;  %3219 = vmatprep.subr.msk.bf16.mxu0 %vm1571_vm7, %v3218_v54 }
 0x14c   : > { %1444 = vmatprep.subr.bf16.mxu1 %v3891_v2 }
 0x14f   : > { %1445 = vmatpush1.bf16.msra.mxu1 %v3686_v4 }
 0x150   : > { %1446 = vmatprep.subr.bf16.mxu1 %v3891_v2 }
 0x153   : > { %1447 = vmatpush1.bf16.msra.mxu1 %v3687_v5  ;;  %v3732_v5 = vld [vmem:[%s4806_s3 + $0x1a0] ss:$8 sps:$4 sm:$0xff]  }
 0x154   : > { %1448 = vmatprep.subr.bf16.mxu1 %v3891_v2 }
 0x157   : > { %1449 = vmatpush1.bf16.msra.mxu1 %v3688_v6 }
 0x158   : > { %1450 = vmatprep.subr.bf16.mxu1 %v3891_v2 }
 0x15b   : > { %1451 = vmatpush1.bf16.msra.mxu1 %v3689_v7  ;;  %v1679_v7 = vsel %vm1571_vm7, %v3217_v1, 0 }
 0x15c   : > { %1452 = vmatprep.subr.bf16.mxu1 %v3891_v2 }
 0x15f   : > { %1453 = vmatpush1.bf16.msra.mxu1 %v3690_v9  ;;  %v3738_v9 = vld [vmem:[%s4806_s3 + $0x44] ss:$8 sps:$4 sm:$0xff]  }
 0x160   : > { %1454 = vmatprep.subr.bf16.mxu1 %v3891_v2 }
 0x163   : > { %1455 = vmatpush1.bf16.msra.mxu1 %v3691_v10  ;;  %v3741_v10 = vld [vmem:[%s4806_s3 + $0x194] ss:$8 sps:$4 sm:$0xff]  }
 0x164   : > { %1466 = vmatprep.subr.bf16.mxu1 %v3891_v2 }
 0x167   : > { %1467 = vmatpush2.bf16.msra.mxu1 %v1438_v12  ;;  %v3739_v12 = vld [vmem:[%s4806_s3 + $0x190] ss:$8 sps:$4 sm:$0xff]  }
 0x168   : > { %1468 = vmatprep.subr.bf16.mxu1 %v3891_v2 }
 0x16b   : > { %1469 = vmatpush2.bf16.msra.mxu1 %v3693_v13  ;;  %v3744_v13 = vld [vmem:[%s4806_s3 + $0x34] ss:$8 sps:$4 sm:$0xff]  }
 0x16c   : > { %1470 = vmatprep.subr.bf16.mxu1 %v3891_v2 }
 0x16f   : > { %1471 = vmatpush2.bf16.msra.mxu1 %v3694_v14  ;;  %v3747_v14 = vld [vmem:[%s4806_s3 + $0x184] ss:$8 sps:$4 sm:$0xff]  }
 0x170   : > { %3244 = vmatprep.subr.msk.bf16.mxu1 %vm1571_vm7, %v3243_v16  ;;  %v3745_v16 = vld [vmem:[%s4806_s3 + $0x180] ss:$8 sps:$4 sm:$0xff]  }
 0x206   : > { %v1337_v28 = vpop.f32.mrf.mxu1 }
 0x208   : > { %v1339_v29 = vpop.f32.mrf.mxu1 }
 0x20a   : > { %v1341_v30 = vpop.f32.mrf.mxu1 }
 0x20b   : > { %v1346_v26 = vpack.c.bf16 %v1341_v30, %v1337_v28  ;;  %v3762_v28 = vld [vmem:[%s4806_s3 + $0x4] ss:$8 sps:$4 sm:$0xff]   ;;  %v3760_v30 = vld [vmem:[%s4806_s3] ss:$8 sps:$4 sm:$0xff]  }
 0x20c   : > { %v1343_v32 = vpop.f32.mrf.mxu1 }
 0x20d   : > { %v1347_v33 = vpack.c.bf16 %v1343_v32, %v1339_v29  ;;  %v3256_v29 = vld [vmem:[%s4806_s3 + $0x158] sm:$0x33] }
 0x20e   : > { %v3268_v32 = vcombine.high %v3256_v29, %v3256_v29 }
 0x20f   : > { %3181 = vmatprep.mubr.msk.bf16.mxu1 %vm1432_vm8, %v1347_v33  ;;  %v3267_v33 = vcombine.low %v3256_v29, %v3256_v29 }
 0x210   : > { %1473 = vmatmul.mubr.bf16.vlgmr.msra.gmra.mxu1 %v1346_v26 }
 0x211   : > { %1810 = vmatpush1.bf16.msra.mxu1 %v1800_v27  ;;  %1837 = vmatprep.mubr.bf16.mxu1 %v3891_v2  ;;  %v1926_v26 = vsel %vm1571_vm7, %v3267_v33, 0  ;;  %v3767_v27 = vld [vmem:[%s4806_s3 + $0x14c] ss:$8 sps:$4 sm:$0xff]  }
 0x212   : > { %1811 = vmatprep.subr.bf16.mxu1 %v3700_v34  ;;  %v3765_v34 = vld [vmem:[%s4806_s3 + $0x148] ss:$8 sps:$4 sm:$0xff]  }
 0x215   : > { %1812 = vmatpush1.bf16.msra.mxu1 %v3698_v35  ;;  %v3770_v35 = vld [vmem:[%s4806_s3 + $0x13c] ss:$8 sps:$4 sm:$0xff]  }
 0x216   : > { %1813 = vmatprep.subr.bf16.mxu1 %v3707_v36  ;;  %v3768_v36 = vld [vmem:[%s4806_s3 + $0x138] ss:$8 sps:$4 sm:$0xff]  }
 0x219   : > { %1814 = vmatpush1.bf16.msra.mxu1 %v3705_v37  ;;  %v3773_v37 = vld [vmem:[%s4806_s3 + $0x12c] ss:$8 sps:$4 sm:$0xff]  }
 0x21a   : > { %1815 = vmatprep.subr.bf16.mxu1 %v3713_v38  ;;  %v3771_v38 = vld [vmem:[%s4806_s3 + $0x128] ss:$8 sps:$4 sm:$0xff]  }
 0x21d   : > { %1816 = vmatpush1.bf16.msra.mxu1 %v3711_v39  ;;  %v3776_v39 = vld [vmem:[%s4806_s3 + $0x11c] ss:$8 sps:$4 sm:$0xff]  }
 0x21e   : > { %1817 = vmatprep.subr.bf16.mxu1 %v3719_v41  ;;  %v3779_v41 = vld [vmem:[%s4806_s3 + $0x10c] ss:$8 sps:$4 sm:$0xff]  }
 0x221   : > { %1818 = vmatpush1.bf16.msra.mxu1 %v3717_v43 }
 0x222   : > { %1819 = vmatprep.subr.bf16.mxu1 %v3725_v46 }
 0x225   : > { %1820 = vmatpush1.bf16.msra.mxu1 %v3723_v48 }
 0x226   : > { %3294 = vmatprep.subr.msk.bf16.mxu1 %vm1571_vm7, %v3293_v51 }
 0x2d0   : > { %v1474_v55 = vpop.f32.mrf.mxu1 }
 0x2d2   : > { %v1476_v57 = vpop.f32.mrf.mxu1 }
 0x2d4   : > { %v1477_v60 = vpop.f32.mrf.mxu1 }
 0x2d5   : > { %v4395_v45 = vpack.c.bf16 %v1477_v60, %v1474_v55 }
 0x2d6   : > { %v1479_v61 = vpop.f32.mrf.mxu1 }
 0x2d7   : > { %v1508_v62 = vshll.u32 %v4395_v45, 16  ;;  %v1740_v63 = vrot.slane %v4395_v45, 1  ;;  %v1506_v3 = vshrl.u32 %v4395_v45, 16  ;;  %v1990_v31 = vrot.slane %v4395_v45, 2 }
 0x2d9   : > { %v1510_v4 = vrot.slane %v1508_v62, 1  ;;  %3245 = vmatmul.mubr.msk.bf16.vlgmr.msra.gmra.mxu1 %vm1567_vm9, %v1740_v63  ;;  %v1864_v43 = vrot.slane %v1506_v3, 1  ;;  %v1865_v44 = vrot.slane %v1508_v62, 2 }
 0x2da   : > { %2060 = vmatpush1.bf16.msra.mxu1 %v2050_v56  ;;  %2087 = vmatprep.mubr.bf16.mxu1 %v3891_v2 }
 0x2db   : > { %v1511_v6 = vor.u32 %v1510_v4, %v1506_v3  ;;  %2061 = vmatprep.subr.bf16.mxu1 %v3734_v0  ;;  %v1866_v46 = vor.u32 %v1865_v44, %v1864_v43  ;;  %v2102_v3 = vld [vmem:[%s4807_s4] sm:$0x3] }
 0x2dc   : > { %v3789_v43 = vld [vmem:[%s4811_s8 + $0x40] sm:$0xff]  }
 0x2dd   : > { %3206 = vmatmul.mubr.msk.bf16.vlgmr.msra.gmra.mxu0 %vm1567_vm9, %v1511_v6  ;;  %v3790_v44 = vld [vmem:[%s4812_s9 + $0x20] sm:$0xff]  }
 0x2de   : > { %1689 = vmatpush1.bf16.msra.mxu0 %v1679_v7  ;;  %2062 = vmatpush1.bf16.msra.mxu1 %v3732_v5 }
 0x2df   : > { %1690 = vmatprep.subr.bf16.mxu0 %v3738_v9  ;;  %2063 = vmatprep.subr.bf16.mxu1 %v3741_v10  ;;  %v2107_v10 = vrot.slane %v2102_v3, %v1257_v8 }
 0x2e0   : > { %1716 = vmatprep.mubr.bf16.mxu0 %v3891_v2 }
 0x2e2   : > { %1691 = vmatpush1.bf16.msra.mxu0 %v3736_v11  ;;  %2064 = vmatpush1.bf16.msra.mxu1 %v3739_v12 }
 0x2e3   : > { %1692 = vmatprep.subr.bf16.mxu0 %v3744_v13  ;;  %2065 = vmatprep.subr.bf16.mxu1 %v3747_v14 }
 0x2e6   : > { %1693 = vmatpush1.bf16.msra.mxu0 %v3742_v15  ;;  %2066 = vmatpush1.bf16.msra.mxu1 %v3745_v16  ;;  %v2111_v16 = vrot.slane %v2102_v3, %v1261_v17  ;;  %v2122_v17 = vld [vmem:[%s4810_s7] sm:$0x7] }
 0x2e7   : > { %1694 = vmatprep.subr.bf16.mxu0 %v3750_v18  ;;  %2067 = vmatprep.subr.bf16.mxu1 %v3753_v19 }
 0x2ea   : > { %1695 = vmatpush1.bf16.msra.mxu0 %v3748_v20  ;;  %2068 = vmatpush1.bf16.msra.mxu1 %v3751_v21 }
 0x2eb   : > { %1696 = vmatprep.subr.bf16.mxu0 %v3756_v22  ;;  %2069 = vmatprep.subr.bf16.mxu1 %v3759_v23 }
 0x2ee   : > { %1697 = vmatpush1.bf16.msra.mxu0 %v3754_v24  ;;  %2070 = vmatpush1.bf16.msra.mxu1 %v3757_v25 }
 0x2ef   : > { %1698 = vmatprep.subr.bf16.mxu0 %v3762_v28 }
 0x2f1   : > { %3295 = vmatmul.mubr.msk.bf16.vlgmr.msra.gmra.mxu1 %vm1567_vm9, %v1990_v31 }
 0x2f2   : > { %1699 = vmatpush1.bf16.msra.mxu0 %v3760_v30 }
 0x2f3   : > { %3269 = vmatprep.subr.msk.bf16.mxu0 %vm1571_vm7, %v3268_v32 }
 0x2f5   : > { %3220 = vmatmul.mubr.msk.bf16.vlgmr.msra.gmra.mxu0 %vm1567_vm9, %v4395_v45 }
 0x2f6   : > { %1936 = vmatpush1.bf16.msra.mxu0 %v1926_v26  ;;  %1963 = vmatprep.mubr.bf16.mxu0 %v3891_v2 }
 0x2f7   : > { %1937 = vmatprep.subr.bf16.mxu0 %v3767_v27 }
 0x2fa   : > { %1938 = vmatpush1.bf16.msra.mxu0 %v3765_v34  ;;  %v3780_v34 = vld [vmem:[%s4811_s8 + $0x38] sm:$0xff]  }
 0x2fb   : > { %1939 = vmatprep.subr.bf16.mxu0 %v3770_v35  ;;  %v3781_v35 = vld [vmem:[%s4811_s8 + $0x30] sm:$0xff]  }
 0x2fe   : > { %1940 = vmatpush1.bf16.msra.mxu0 %v3768_v36  ;;  %v3782_v36 = vld [vmem:[%s4811_s8 + $0x28] sm:$0xff]  }
 0x2ff   : > { %1941 = vmatprep.subr.bf16.mxu0 %v3773_v37  ;;  %v3783_v37 = vld [vmem:[%s4811_s8 + $0x20] sm:$0xff]  }
 0x302   : > { %1942 = vmatpush1.bf16.msra.mxu0 %v3771_v38  ;;  %v3784_v38 = vld [vmem:[%s4811_s8 + $0x18] sm:$0xff]  }
 0x303   : > { %1943 = vmatprep.subr.bf16.mxu0 %v3776_v39  ;;  %v3785_v39 = vld [vmem:[%s4811_s8 + $0x10] sm:$0xff]  }
 0x306   : > { %1944 = vmatpush1.bf16.msra.mxu0 %v3774_v40  ;;  %v3786_v40 = vld [vmem:[%s4811_s8 + $0x8] sm:$0xff]  }
 0x307   : > { %1945 = vmatprep.subr.bf16.mxu0 %v3779_v41  ;;  %v3787_v41 = vld [vmem:[%s4811_s8] sm:$0xff]  }
 0x30a   : > { %1946 = vmatpush1.bf16.msra.mxu0 %v3777_v42  ;;  %v3788_v42 = vld [vmem:[%s4811_s8 + $0x48] sm:$0xff]  }
 0x30d   : > { %3270 = vmatmul.mubr.msk.bf16.vlgmr.msra.gmra.mxu0 %vm1567_vm9, %v1866_v46  ;;  %v3892_v46 = vmov 0.0  }
 0x30e   : > { %2168 = vmatprep.mubr.bf16.mxu0 %v3891_v2  ;;  %3445 = vmatprep.subr.bf16.mxu1 %v3892_v46 }
 0x30f   : > { %3446 = vmatpush3.bf16.msra.mxu1 %v3790_v44  ;;  %3455 = vmatprep.mubr.msk.bf16.mxu1 %vm3893_vm13, %v3892_v46 }
 0x310   : > { %3447 = vmatprep.subr.bf16.mxu1 %v3892_v46 }
 0x399   : > { %v1839_v49 = vpop.f32.mrf.mxu1 }
 0x39b   : > { %v1841_v52 = vpop.f32.mrf.mxu1 }
 0x39d   : > { %v1612_v47 = vpop.f32.mrf.mxu0  ;;  %v1843_v54 = vpop.f32.mrf.mxu1 }
 0x39f   : > { %v1614_v48 = vpop.f32.mrf.mxu0  ;;  %v1845_v57 = vpop.f32.mrf.mxu1 }
 0x3a1   : > { %v1616_v50 = vpop.f32.mrf.mxu0 }
 0x3a3   : > { %v1618_v51 = vpop.f32.mrf.mxu0 }
 0x3b1   : > { %v2089_v45 = vpop.f32.mrf.mxu1 }
 0x3b3   : > { %v2091_v0 = vpop.f32.mrf.mxu1 }
 0x3b5   : > { %v1718_v53 = vpop.f32.mrf.mxu0  ;;  %v2093_v13 = vpop.f32.mrf.mxu1 }
 0x3b6   : > { %v1719_v60 = vadd.f32 %v1718_v53, %v1612_v47  ;;  %v3792_v47 = vld [vmem:[%s4812_s9 + $0x18] sm:$0xff]   ;;  %v3791_v53 = vld [vmem:[%s4812_s9 + $0x70] sm:$0xff]  }
 0x3b7   : > { %v1720_v55 = vpop.f32.mrf.mxu0  ;;  %v2095_v24 = vpop.f32.mrf.mxu1  ;;  %3448 = vmatpush3.bf16.msra.mxu1 %v3792_v47 }
 0x3b8   : > { %v1721_v61 = vadd.f32 %v1720_v55, %v1614_v48  ;;  %v1848_v56 = vadd.f32 %v1839_v49, %v1719_v60  ;;  %3449 = vmatprep.subr.bf16.mxu1 %v3892_v46  ;;  %v3796_v48 = vld [vmem:[%s4812_s9 + $0x8] sm:$0xff]   ;;  %v3795_v60 = vld [vmem:[%s4812_s9 + $0x60] sm:$0xff]  }
 0x3b9   : > { %v1722_v58 = vpop.f32.mrf.mxu0 }
 0x3ba   : > { %v1723_v63 = vadd.f32 %v1722_v58, %v1616_v50  ;;  %v1849_v6 = vadd.f32 %v1841_v52, %v1721_v61  ;;  %v3798_v50 = vld [vmem:[%s4812_s9] sm:$0xff]   ;;  %v3793_v58 = vld [vmem:[%s4812_s9 + $0x68] sm:$0xff]   ;;  %v3799_v61 = vld [vmem:[%s4812_s9 + $0x50] sm:$0xff]  }
 0x3bb   : > { %v1724_v62 = vpop.f32.mrf.mxu0 }
 0x3bc   : > { %v1725_v4 = vadd.f32 %v1724_v62, %v1618_v51  ;;  %v1850_v12 = vadd.f32 %v1843_v54, %v1723_v63  ;;  %v3800_v63 = vld [vmem:[%s4812_s9 + $0x48] sm:$0xff]  }
 0x3be   : > { %v1851_v19 = vadd.f32 %v1845_v57, %v1725_v4 }
 0x3cd   : > { %v1965_v1 = vpop.f32.mrf.mxu0 }
 0x3ce   : > { %v1974_v5 = vadd.f32 %v1965_v1, %v1848_v56  ;;  %v3801_v1 = vld [vmem:[%s4812_s9 + $0xc0] sm:$0xff]  }
 0x3cf   : > { %v1967_v7 = vpop.f32.mrf.mxu0 }
 0x3d0   : > { %v2098_v9 = vadd.f32 %v2089_v45, %v1974_v5  ;;  %v1975_v11 = vadd.f32 %v1967_v7, %v1849_v6  ;;  %v3797_v45 = vld [vmem:[%s4812_s9 + $0x58] sm:$0xff]   ;;  %v3802_v5 = vld [vmem:[%s4812_s9 + $0x40] sm:$0xff]  }
 0x3d1   : > { %v1969_v14 = vpop.f32.mrf.mxu0  ;;  %v3803_v7 = vld [vmem:[%s4812_s9 + $0xb8] sm:$0xff]  }
 0x3d2   : > { %v2099_v15 = vadd.f32 %v2091_v0, %v1975_v11  ;;  %v1976_v18 = vadd.f32 %v1969_v14, %v1850_v12  ;;  %v2114_v21 = vadd.f32 %v2107_v10, %v2098_v9  ;;  %v3804_v9 = vld [vmem:[%s4812_s9 + $0x38] sm:$0xff]   ;;  %v3806_v11 = vld [vmem:[%s4812_s9 + $0x30] sm:$0xff]   ;;  %v3807_v12 = vld [vmem:[%s4812_s9 + $0xa8] sm:$0xff]  }
 0x3d3   : > { %v1971_v20 = vpop.f32.mrf.mxu0  ;;  %v3809_v14 = vld [vmem:[%s4812_s9 + $0xa0] sm:$0xff]  }
 0x3d4   : > { %v2100_v22 = vadd.f32 %v2093_v13, %v1976_v18  ;;  %v1977_v23 = vadd.f32 %v1971_v20, %v1851_v19  ;;  %v2115_v25 = vadd.f32 %v2111_v16, %v2099_v15  ;;  %v2118_v30 = vmax.f32 %v2114_v21, 0.0  ;;  %v3808_v13 = vld [vmem:[%s4812_s9 + $0x28] sm:$0xff]   ;;  %v3810_v15 = vld [vmem:[%s4812_s9 + $0x98] sm:$0xff]   ;;  %v3811_v19 = vld [vmem:[%s4812_s9 + $0x90] sm:$0xff]  }
 0x3d5   : > { %v3812_v20 = vld [vmem:[%s4812_s9 + $0x88] sm:$0xff]   ;;  %v3813_v21 = vld [vmem:[%s4812_s9 + $0x80] sm:$0xff]  }
 0x3d6   : > { %v2116_v28 = vadd.f32 %v2107_v10, %v2100_v22  ;;  %v2101_v29 = vadd.f32 %v2095_v24, %v1977_v23  ;;  %v2119_v32 = vmax.f32 %v2115_v25, 0.0  ;;  %v3805_v10 = vld [vmem:[%s4812_s9 + $0xb0] sm:$0xff]   ;;  %v3814_v22 = vld [vmem:[%s4812_s9 + $0x78] sm:$0xff]  }
 0x3d7   : > { %v3815_v24 = vld [vmem:[%s4814_s11 + $0x38] ss:$0 sps:$4 sm:$0xff]  }
 0x3d8   : > { %v2120_v8 = vmax.f32 %v2116_v28, 0.0  ;;  %v2117_v31 = vadd.f32 %v2111_v16, %v2101_v29  ;;  %v2806_v25 = vsel %vm1436_vm6, %v3815_v24, 0  ;;  %v3816_v28 = vld [vmem:[%s4814_s11 + $0x30] sm:$0xff]   ;;  %v3817_v29 = vld [vmem:[%s4814_s11 + $0x28] sm:$0xff]  }
 0x3da   : > { %v2121_v33 = vmax.f32 %v2117_v31, 0.0  ;;  %v2123_v26 = vpack.c.bf16 %v2120_v8, %v2118_v30  ;;  %v3818_v30 = vld [vmem:[%s4814_s11 + $0x20] sm:$0xff]   ;;  %v3819_v8 = vld [vmem:[%s4814_s11 + $0x18] sm:$0xff]   ;;  %v3820_v31 = vld [vmem:[%s4814_s11 + $0x10] sm:$0xff]  }
 0x3dc   : > { %v2124_v27 = vpack.c.bf16 %v2121_v33, %v2119_v32  ;;  %v2131_v59 = vsel %vm2129_vm10, %v2123_v26, 0  ;;  %v3821_v32 = vld [vmem:[%s4814_s11 + $0x8] sm:$0xff]   ;;  %v3822_v33 = vld [vmem:[%s4814_s11] sm:$0xff]  }
 0x3dd   : > { %v3823_v26 = vld [vmem:[%s4816_s13 + $0x28] ss:$0 sps:$4 sm:$0x33]  }
 0x3de   : > { %3296 = vmatprep.subr.msk.bf16.mxu0 %vm2129_vm10, %v2124_v27  ;;  %v2899_v27 = vsel %vm1571_vm7, %v3823_v26, 0 }
 0x3df   : > { %2151 = vmatpush1.bf16.msra.mxu0 %v2131_v59  ;;  %v3824_v59 = vld [vmem:[%s4816_s13 + $0x20] sm:$0xff]  }
 0x3e0   : > { %2263 = vmatprep.subr.bf16.mxu0 %v3891_v2 }
 0x3e2   : > { %3297 = vmatmul.mubr.msk.bf16.vlgmr.msra.gmra.mxu0 %vm2125_vm11, %v2122_v17  ;;  %v3825_v17 = vld [vmem:[%s4816_s13 + $0x18] sm:$0xff]  }
 0x3e3   : > { %2264 = vmatpush1.bf16.msra.mxu0 %v3780_v34  ;;  %v3826_v34 = vld [vmem:[%s4816_s13 + $0x10] sm:$0xff]  }
 0x3e4   : > { %2265 = vmatprep.subr.bf16.mxu0 %v3891_v2 }
 0x3e7   : > { %2266 = vmatpush1.bf16.msra.mxu0 %v3781_v35 }
 0x3e8   : > { %2267 = vmatprep.subr.bf16.mxu0 %v3891_v2 }
 0x3eb   : > { %2268 = vmatpush1.bf16.msra.mxu0 %v3782_v36 }
 0x3ec   : > { %2269 = vmatprep.subr.bf16.mxu0 %v3891_v2 }
 0x3ef   : > { %2270 = vmatpush1.bf16.msra.mxu0 %v3783_v37 }
 0x3f0   : > { %2271 = vmatprep.subr.bf16.mxu0 %v3891_v2 }
 0x3f3   : > { %2272 = vmatpush1.bf16.msra.mxu0 %v3784_v38 }
 0x3f4   : > { %2273 = vmatprep.subr.bf16.mxu0 %v3891_v2 }
 0x3f7   : > { %2274 = vmatpush1.bf16.msra.mxu0 %v3785_v39 }
 0x3f8   : > { %2275 = vmatprep.subr.bf16.mxu0 %v3891_v2 }
 0x3fb   : > { %2276 = vmatpush1.bf16.msra.mxu0 %v3786_v40 }
 0x3fc   : > { %2277 = vmatprep.subr.bf16.mxu0 %v3891_v2 }
 0x3ff   : > { %2278 = vmatpush1.bf16.msra.mxu0 %v3787_v41 }
 0x400   : > { %2291 = vmatprep.subr.bf16.mxu0 %v3891_v2 }
 0x403   : > { %2292 = vmatpush2.bf16.msra.mxu0 %v3788_v42 }
 0x404   : > { %2293 = vmatprep.subr.bf16.mxu0 %v3891_v2  ;;  %v3794_v2 = vld [vmem:[%s4812_s9 + $0x10] sm:$0xff]  }
 0x405   : > { %3450 = vmatpush3.bf16.msra.mxu1 %v3794_v2 }
 0x406   : > { %3451 = vmatprep.subr.bf16.mxu1 %v3892_v46 }
 0x407   : > { %2294 = vmatpush2.bf16.msra.mxu0 %v3789_v43 }
 0x408   : > { %3473 = vmatprep.subr.bf16.mxu0 %v3892_v46 }
 0x409   : > { %3452 = vmatpush3.bf16.msra.mxu1 %v3796_v48 }
 0x40a   : > { %3453 = vmatprep.subr.bf16.mxu1 %v3892_v46 }
 0x40d   : > { %3454 = vmatpush3.bf16.msra.mxu1 %v3798_v50 }
 0x40e   : > { %3459 = vmatprep.subr.bf16.mxu1 %v3892_v46 }
 0x4a2   : > { %v2170_v49 = vpop.f32.mrf.mxu0 }
 0x4a3   : > { %v2177_v54 = vpack.c.bf16 %v2170_v49, %v2170_v49 }
 0x4a4   : > { %v2172_v51 = vpop.f32.mrf.mxu0 }
 0x4a5   : > { %v2178_v52 = vpack.c.bf16 %v2172_v51, %v2172_v51 }
 0x4a6   : > { %v2174_v55 = vpop.f32.mrf.mxu0 }
 0x4a7   : > { %3308 = vmatprep.mubr.msk.bf16.mxu0 %vm2259_vm12, %v2178_v52  ;;  %v2305_v52 = vld [vmem:[%s4813_s10] sm:$0x1] }
 0x4a8   : > { %2296 = vmatmul.mubr.bf16.vlgmr.msra.gmra.mxu0 %v2177_v54  ;;  %v2175_v57 = vpop.f32.mrf.mxu0 }
 0x4a9   : > { %3474 = vmatpush3.bf16.msra.mxu0 %v3791_v53  ;;  %3483 = vmatprep.mubr.msk.bf16.mxu0 %vm3893_vm13, %v3892_v46 }
 0x4aa   : > { %3475 = vmatprep.subr.bf16.mxu0 %v3892_v46 }
 0x4ad   : > { %3476 = vmatpush3.bf16.msra.mxu0 %v3793_v58 }
 0x4ae   : > { %3477 = vmatprep.subr.bf16.mxu0 %v3892_v46 }
 0x4b1   : > { %3478 = vmatpush3.bf16.msra.mxu0 %v3795_v60 }
 0x4b2   : > { %3479 = vmatprep.subr.bf16.mxu0 %v3892_v46 }
 0x4b5   : > { %3480 = vmatpush3.bf16.msra.mxu0 %v3797_v45 }
 0x4b6   : > { %3481 = vmatprep.subr.bf16.mxu0 %v3892_v46 }
 0x4b9   : > { %3482 = vmatpush3.bf16.msra.mxu0 %v3799_v61 }
 0x4ba   : > { %3501 = vmatprep.subr.bf16.mxu0 %v3892_v46 }
 0x568   : > { %v2297_v62 = vpop.f32.mrf.mxu0 }
 0x569   : > { %2304 = vst.msk [vmem:[%s529_s0] sm:$0x1f] %vm2303_vm14, %v2297_v62  ;;  %v2306_v56 = vpack.c.bf16 %v2297_v62, %v2297_v62  ;;  %s513_s0 = sand.u32 1, %s3881_s22  }
 0x56a   : > { %v2299_v0 = vpop.f32.mrf.mxu0  ;;  %s514_s19 = scalar_lea.vmem [#allocation2], %s513_s0  ;;  %s2944_s12 = scalar_lea.sflag [#allocation3], %s513_s0 }
 0x56b   : > { %v2491_v3 = vrot.slane %v2306_v56, 1  ;;  %3456 = vmatmul.mubr.msk.bf16.vlgmr.msra.gmra.mxu1 %vm2347_vm15, %v2306_v56  ;;  %v2403_v16 = vshrl.u32 %v2306_v56, 16  ;;  %v2663_v18 = vrot.slane %v2306_v56, 2  ;;  %v3827_v0 = vld [vmem:[%s4816_s13 + $0x8] sm:$0xff]   ;;  %s2960_s20 = sshll.u32 %s514_s19, 4  ;;  %s4764_s20 = int_to_ptr.vmem [resolvable:$true] %s2960_s20 }
 0x56c   : > { %3460 = vmatpush3.bf16.msra.mxu1 %v3800_v63  ;;  %v2300_v4 = vpop.f32.mrf.mxu0  ;;  %3469 = vmatprep.mubr.msk.bf16.mxu1 %vm3893_vm13, %v3892_v46  ;;  %s3829_s25 = scalar_lea.vmem %s4764_s20, 16  ;;  %p3836_p0 = scmp.lt.s32.totalorder %s4764_s20, %s3834_s15 }
 0x56d   : > { %3484 = vmatmul.mubr.msk.bf16.vlgmr.msra.gmra.mxu0 %vm2347_vm15, %v2491_v3  ;;  %3461 = vmatprep.subr.bf16.mxu1 %v3892_v46  ;;  %v2577_v23 = vrot.slane %v2403_v16, 1  ;;  %v2755_v3 = vld [vmem:[%s4843_s24] sm:$0x1]  ;;  %p3830_p11 = scmp.ne.s32.totalorder %s4764_s20, %s3829_s25  ;;  %s3835_s24 = scalar_lea.vmem %s3834_s15, 32 }
 0x56e   : > { %3502 = vmatpush3.bf16.msra.mxu0 %v3801_v1  ;;  %v2301_v6 = vpop.f32.mrf.mxu0  ;;  %3511 = vmatprep.mubr.msk.bf16.mxu0 %vm3893_vm13, %v3892_v46  ;;  %v3828_v1 = vld [vmem:[%s4816_s13] sm:$0xff]   ;;  %p3837_p1 = scmp.lt.s32.totalorder %s3835_s24, %s3829_s25 }
 0x56f   : > { %3503 = vmatprep.subr.bf16.mxu0 %v3892_v46  ;;  %p3831_p12 = pnand %p3830_p11, %p4018_p5 }
 0x570   : > { %3462 = vmatpush3.bf16.msra.mxu1 %v3802_v5  ;;  %p3838_p2 = por %p3837_p1, %p3836_p0 }
 0x571   : > { %3463 = vmatprep.subr.bf16.mxu1 %v3892_v46  ;;  %p3832_p13 = pneg %p3831_p12 }
 0x572   : > { %3504 = vmatpush3.bf16.msra.mxu0 %v3803_v7 }
 0x573   : > { %3505 = vmatprep.subr.bf16.mxu0 %v3892_v46  ;;  %p3839_p3 = pnand %p3838_p2, %p3832_p13 }
 0x574   : > { %3464 = vmatpush3.bf16.msra.mxu1 %v3804_v9 }
 0x575   : > { %3465 = vmatprep.subr.bf16.mxu1 %v3892_v46 }
 0x576   : > { %3506 = vmatpush3.bf16.msra.mxu0 %v3805_v10 }
 0x577   : > { %3507 = vmatprep.subr.bf16.mxu0 %v3892_v46 }
 0x578   : > { %3466 = vmatpush3.bf16.msra.mxu1 %v3806_v11 }
 0x579   : > { %3467 = vmatprep.subr.bf16.mxu1 %v3892_v46 }
 0x57a   : > { %3508 = vmatpush3.bf16.msra.mxu0 %v3807_v12 }
 0x57b   : > { %3509 = vmatprep.subr.bf16.mxu0 %v3892_v46 }
 0x57c   : > { %3468 = vmatpush3.bf16.msra.mxu1 %v3808_v13 }
 0x57d   : > { %3487 = vmatprep.subr.bf16.mxu1 %v3892_v46 }
 0x57e   : > { %3510 = vmatpush3.bf16.msra.mxu0 %v3809_v14 }
 0x57f   : > { %3470 = vmatmul.mubr.msk.bf16.vlgmr.msra.gmra.mxu1 %vm2347_vm15, %v2403_v16  ;;  %3535 = vmatprep.subr.bf16.mxu0 %v3892_v46 }
 0x580   : > { %3488 = vmatpush3.bf16.msra.mxu1 %v3810_v15  ;;  %3497 = vmatprep.mubr.msk.bf16.mxu1 %vm3893_vm13, %v3892_v46 }
 0x581   : > { %3512 = vmatmul.mubr.msk.bf16.vlgmr.msra.gmra.mxu0 %vm2347_vm15, %v2663_v18  ;;  %3489 = vmatprep.subr.bf16.mxu1 %v3892_v46 }
 0x582   : > { %3547 = vmatprep.mubr.msk.bf16.mxu0 %vm3893_vm13, %v3892_v46  ;;  %3536 = vmatpush3.bf16.msra.mxu0 %v2899_v27 }
 0x583   : > { %3537 = vmatprep.subr.bf16.mxu0 %v3892_v46 }
 0x584   : > { %3490 = vmatpush3.bf16.msra.mxu1 %v3811_v19 }
 0x585   : > { %3491 = vmatprep.subr.bf16.mxu1 %v3892_v46 }
 0x586   : > { %3538 = vmatpush3.bf16.msra.mxu0 %v3824_v59 }
 0x587   : > { %3539 = vmatprep.subr.bf16.mxu0 %v3892_v46 }
 0x588   : > { %3492 = vmatpush3.bf16.msra.mxu1 %v3812_v20 }
 0x589   : > { %3493 = vmatprep.subr.bf16.mxu1 %v3892_v46 }
 0x58a   : > { %3540 = vmatpush3.bf16.msra.mxu0 %v3825_v17 }
 0x58b   : > { %3541 = vmatprep.subr.bf16.mxu0 %v3892_v46 }
 0x58c   : > { %3494 = vmatpush3.bf16.msra.mxu1 %v3813_v21 }
 0x58d   : > { %3495 = vmatprep.subr.bf16.mxu1 %v3892_v46 }
 0x58e   : > { %3542 = vmatpush3.bf16.msra.mxu0 %v3826_v34 }
 0x58f   : > { %3543 = vmatprep.subr.bf16.mxu0 %v3892_v46 }
 0x590   : > { %3496 = vmatpush3.bf16.msra.mxu1 %v3814_v22 }
 0x591   : > { %3515 = vmatprep.subr.bf16.mxu1 %v3892_v46 }
 0x592   : > { %3544 = vmatpush3.bf16.msra.mxu0 %v3827_v0 }
 0x593   : > { %3498 = vmatmul.mubr.msk.bf16.vlgmr.msra.gmra.mxu1 %vm2347_vm15, %v2577_v23  ;;  %3545 = vmatprep.subr.bf16.mxu0 %v3892_v46 }
 0x594   : > { %3531 = vmatprep.mubr.msk.bf16.mxu1 %vm3893_vm13, %v3892_v46  ;;  %3516 = vmatpush3.bf16.msra.mxu1 %v2806_v25 }
 0x595   : > { %3517 = vmatprep.subr.bf16.mxu1 %v3892_v46 }
 0x596   : > { %3546 = vmatpush3.bf16.msra.mxu0 %v3828_v1 }
 0x598   : > { %3518 = vmatpush3.bf16.msra.mxu1 %v3816_v28 }
 0x599   : > { %3519 = vmatprep.subr.bf16.mxu1 %v3892_v46 }
 0x59c   : > { %3520 = vmatpush3.bf16.msra.mxu1 %v3817_v29 }
 0x59d   : > { %3521 = vmatprep.subr.bf16.mxu1 %v3892_v46 }
 0x5a0   : > { %3522 = vmatpush3.bf16.msra.mxu1 %v3818_v30 }
 0x5a1   : > { %3523 = vmatprep.subr.bf16.mxu1 %v3892_v46 }
 0x5a4   : > { %3524 = vmatpush3.bf16.msra.mxu1 %v3819_v8 }
 0x5a5   : > { %3525 = vmatprep.subr.bf16.mxu1 %v3892_v46 }
 0x5a8   : > { %3526 = vmatpush3.bf16.msra.mxu1 %v3820_v31 }
 0x5a9   : > { %3527 = vmatprep.subr.bf16.mxu1 %v3892_v46 }
 0x5ac   : > { %3528 = vmatpush3.bf16.msra.mxu1 %v3821_v32 }
 0x5ad   : > { %3529 = vmatprep.subr.bf16.mxu1 %v3892_v46  ;;  %v2861_v46 = vld [vmem:[%s4844_s30] sm:$0x1] }
 0x5b0   : > { %3530 = vmatpush3.bf16.msra.mxu1 %v3822_v33 }
 0x62b   : > { %v2385_v35 = vpop.f32.mrf.mxu1 }
 0x62c   : > { %v2391_v53 = vadd.f32 %v2385_v35, %v2305_v52 }
 0x62d   : > { %v3457_v36 = vpop.f32.mrf.mxu1  ;;  %v2559_v37 = vpop.f32.mrf.mxu0 }
 0x62f   : > { %v2388_v38 = vpop.f32.mrf.mxu1  ;;  %v3485_v39 = vpop.f32.mrf.mxu0 }
 0x631   : > { %v3458_v40 = vpop.f32.mrf.mxu1  ;;  %v2562_v41 = vpop.f32.mrf.mxu0 }
 0x633   : > { %v3486_v42 = vpop.f32.mrf.mxu0 }
 0x63f   : > { %v2472_v43 = vpop.f32.mrf.mxu1 }
 0x640   : > { %v2478_v54 = vadd.f32 %v2472_v43, %v2391_v53 }
 0x641   : > { %v3471_v44 = vpop.f32.mrf.mxu1  ;;  %v2731_v47 = vpop.f32.mrf.mxu0 }
 0x642   : > { %v2565_v55 = vadd.f32 %v2559_v37, %v2478_v54 }
 0x643   : > { %v2475_v2 = vpop.f32.mrf.mxu1  ;;  %v3513_v48 = vpop.f32.mrf.mxu0 }
 0x645   : > { %v3472_v50 = vpop.f32.mrf.mxu1  ;;  %v2734_v49 = vpop.f32.mrf.mxu0 }
 0x647   : > { %v3514_v51 = vpop.f32.mrf.mxu0 }
 0x653   : > { %v2645_v57 = vpop.f32.mrf.mxu1 }
 0x654   : > { %v2651_v58 = vadd.f32 %v2645_v57, %v2565_v55 }
 0x655   : > { %v3499_v60 = vpop.f32.mrf.mxu1 }
 0x656   : > { %v2737_v45 = vadd.f32 %v2731_v47, %v2651_v58 }
 0x657   : > { %v2648_v61 = vpop.f32.mrf.mxu1 }
 0x658   : > { %v2738_v62 = vmax.f32 %v2737_v45, 0.0 }
 0x659   : > { %v3500_v63 = vpop.f32.mrf.mxu1 }
 0x65a   : > { %v2739_v56 = vpack.c.bf16 %v2738_v62, %v2738_v62 }
 0x65c   : > { %3532 = vmatmul.mubr.msk.bf16.vlgmr.msra.gmra.mxu1 %vm2801_vm0, %v2739_v56 }
 0x71c   : > { %v2842_v4 = vpop.f32.mrf.mxu1 }
 0x71d   : > { %v2843_v5 = vadd.f32 %v2842_v4, %v2755_v3 }
 0x71e   : > { %v3533_v6 = vpop.f32.mrf.mxu1 }
 0x71f   : > { %v2848_v7 = vmax.f32 %v2843_v5, 0.0 }
 0x720   : > { %v2845_v9 = vpop.f32.mrf.mxu1 }
 0x721   : > { %v2849_v10 = vpack.c.bf16 %v2848_v7, %v2848_v7 }
 0x722   : > { %v3534_v11 = vpop.f32.mrf.mxu1 }
 0x723   : > { %3548 = vmatmul.mubr.msk.bf16.vlgmr.msra.gmra.mxu0 %vm1567_vm9, %v2849_v10 }
 0x7e3   : > { %v2935_v12 = vpop.f32.mrf.mxu0 }
 0x7e4   : > { %v2936_v13 = vadd.f32 %v2935_v12, %v2861_v46 }
 0x7e5   : > { %v3549_v14 = vpop.f32.mrf.mxu0 }
 0x7e6   : > { %2942 = vst.msk [vmem:[%s514_s19] sm:$0x1] %vm2941_vm1, %v2936_v13 }
 0x7e7   : > { %v2938_v15 = vpop.f32.mrf.mxu0 }
 0x7e8   : > { %3842 = shalt.err (!%p3839_p3)
}
 0x7e9   : > { %s3843_s29 = scalar_lea.hbm %s4762_s28, 16  ;;  %s3847_s30 = scalar_lea.hbm %s4846_s26, 32 }
 0x7ea   : > { %p3844_p4 = scmp.ne.s32.totalorder %s4762_s28, %s3843_s29  ;;  %p3848_p9 = scmp.lt.s32.totalorder %s4762_s28, %s4846_s26 }
 0x7eb   : > { %p3849_p10 = scmp.lt.s32.totalorder %s3847_s30, %s3843_s29 }
 0x7ec   : > { %p3845_p7 = pnand %p3844_p4, %p4018_p5 }
 0x7ed   : > { %p3850_p11 = por %p3849_p10, %p3848_p9 }
 0x7ee   : > { %p3846_p8 = pneg %p3845_p7 }
 0x7f0   : > { %p3851_p12 = pnand %p3850_p11, %p3846_p8 }
 0x7f2   : > { %3854 = shalt.err (!%p3851_p12)
}
 0x7f3   : > { %3551 = dma.vmem_to_hbm [thread:$0]  (%p4018_p5), %s4764_s20, 16, %s4762_s28, %s2944_s12   ;;  %v3550_v16 = vpop.f32.mrf.mxu0 }
 0x7f4 PF: > { %s4847_s27 = sld [smem:[#allocation7_spill]] }
 0x7f5   : > { %s4848_s17 = sld [smem:[#allocation5_spill]] }
 0x7fa   : > { %p3557_p13 = scmp.ge.s32.totalorder %s4847_s27, 2 }
 0x7fb   : > { %s2975_s14 = sand.u32 1, %s4848_s17  }
 0x7fc   : > { %p3554_p0 = pnand %p3557_p13, %p4022_p6  ;;  %s2976_s15 = scalar_lea.sflag [#allocation3], %s2975_s14 }
 0x7fe   : > { %p3555_p1 = pneg %p3554_p0 }
 0x800   : > { %3872 = dma.done.wait (%p3555_p1), %s2976_s15, 16  }
 0x801   : > { %3874 = vsyncadd (%p3555_p1), %s2976_s15, 4294967280  ;;  %s4850_s24 = sld [smem:[#allocation8_spill]]  ;;  %s4853_s21 = smov %s3881_s22 }
 0x802   : > { %s4851_s29 = sld [smem:[#allocation6_spill]] }
 0x803   : > { %s4852_s23 = sld [smem:[#allocation9_spill]] }
 0x807   : > { %p27_p2 = scmp.ge.s32.totalorder %s4850_s24, 4  }
 0x808   : > { %s4854_s22 = smov %s4851_s29 }
 0x809   :  { %29 = sbr.rel (!%p27_p2) target bundleno = 8 (0x8), region = 139 }
 0x80e   :  { %2987 = vsyncpa [#allocation3], 1 }
 0x80f   :  { %2989 = vsyncpa [#allocation3 + $0x1], 1 }

</bundles_post_ra>
